<compile_context>
chip_gen: v7x
topology: tpu7x:2x2x1
jax: 0.10.0
libtpu: 0.0.40
codegen_flags: <defaults>
</compile_context>

<pallas_src>
import functools

import jax
import jax.numpy as jnp
import numpy as np
from jax.experimental import pallas as pl
from jax.experimental.pallas import tpu as pltpu  # noqa: F401


# ---------------------------------------------------------------------------
# Single fused Pallas kernel: LSTM layer 1 -> LSTM layer 2 -> label head+ReLU.
# PyTorch gate order: i, f, g, o. Zero initial (h, c). All math in float32.
# ---------------------------------------------------------------------------
def _lstm_model_kernel(x_ref, wih1_ref, whh1_ref, b1_ref,
                       wih2_ref, whh2_ref, b2_ref,
                       wfc_ref, bfc_ref, out_ref):
    F, T = wfc_ref.shape
    H1 = whh1_ref.shape[0]
    H2 = whh2_ref.shape[0]
    TB = x_ref.shape[0]
    B = TB // T

    def lstm_scan(gates_x, whh_t, H):
        """gates_x: (T*B, 4H) precomputed x-projection (+bias). Returns list of h_t."""
        h = jnp.zeros((B, H), jnp.float32)
        c = jnp.zeros((B, H), jnp.float32)
        hs = []
        for t in range(T):  # T is small and static -> fully unrolled
            g = gates_x[t * B:(t + 1) * B, :] + jnp.dot(
                h, whh_t, preferred_element_type=jnp.float32)        # (B, 4H)
            i_g = jax.nn.sigmoid(g[:, 0 * H:1 * H])
            f_g = jax.nn.sigmoid(g[:, 1 * H:2 * H])
            g_g = jnp.tanh(g[:, 2 * H:3 * H])
            o_g = jax.nn.sigmoid(g[:, 3 * H:4 * H])
            c = f_g * c + i_g * g_g
            h = o_g * jnp.tanh(c)
            hs.append(h)
        return hs

    # ---- Layer 1: hoisted input projection (one matmul for all time steps).
    gates_x1 = jnp.dot(x_ref[...], wih1_ref[...],
                       preferred_element_type=jnp.float32) + b1_ref[...]
    h1_list = lstm_scan(gates_x1, whh1_ref[...], H1)

    # ---- Layer 2: same structure, fed by layer-1 hidden sequence.
    h1_seq = jnp.concatenate(h1_list, axis=0)                        # (T*B, H1)
    gates_x2 = jnp.dot(h1_seq, wih2_ref[...],
                       preferred_element_type=jnp.float32) + b2_ref[...]
    h2_list = lstm_scan(gates_x2, whh2_ref[...], H2)

    # ---- Label head + ReLU, fused.
    # out[b, f, j] = relu( sum_t wfc[f, t] * h2_t[b, j] + bfc[f] )
    wfc = wfc_ref[...]                                               # (F, T)
    bfc = bfc_ref[...]                                               # (F, H2)
    for b in range(B):                                               # B is tiny/static
        hb = jnp.concatenate([h2_list[t][b:b + 1, :] for t in range(T)],
                             axis=0)                                 # (T, H2)
        yb = jnp.dot(wfc, hb, preferred_element_type=jnp.float32) + bfc
        out_ref[b] = jnp.maximum(yb, 0.0).astype(out_ref.dtype)      # (F, H2)


def lstm_model_forward_pallas(x, params):
    """x: (T, B, In) -> logits (B, H2, F) (then squeezed)."""
    T, B, In = x.shape
    H1 = params["w_hh1"].shape[1]
    H2 = params["w_hh2"].shape[1]
    F = params["w_fc"].shape[0]
    f32 = jnp.float32

    # One-time (XLA-side) layout prep: pre-transposed weights, combined biases.
    x2d = x.reshape(T * B, In).astype(f32)
    wih1_t = params["w_ih1"].T.astype(f32)                     # (In, 4H1)
    whh1_t = params["w_hh1"].T.astype(f32)                     # (H1, 4H1)
    b1 = (params["b_ih1"] + params["b_hh1"]).reshape(1, 4 * H1).astype(f32)
    wih2_t = params["w_ih2"].T.astype(f32)                     # (H1, 4H2)
    whh2_t = params["w_hh2"].T.astype(f32)                     # (H2, 4H2)
    b2 = (params["b_ih2"] + params["b_hh2"]).reshape(1, 4 * H2).astype(f32)
    wfc = params["w_fc"].astype(f32)                           # (F, T)
    bfc = jnp.broadcast_to(params["b_fc"].astype(f32)[:, None], (F, H2))

    out = pl.pallas_call(
        _lstm_model_kernel,
        out_shape=jax.ShapeDtypeStruct((B, F, H2), f32),
        in_specs=[
            pl.BlockSpec((T * B, In), lambda: (0, 0)),
            pl.BlockSpec((In, 4 * H1), lambda: (0, 0)),
            pl.BlockSpec((H1, 4 * H1), lambda: (0, 0)),
            pl.BlockSpec((1, 4 * H1), lambda: (0, 0)),
            pl.BlockSpec((H1, 4 * H2), lambda: (0, 0)),
            pl.BlockSpec((H2, 4 * H2), lambda: (0, 0)),
            pl.BlockSpec((1, 4 * H2), lambda: (0, 0)),
            pl.BlockSpec((F, T), lambda: (0, 0)),
            pl.BlockSpec((F, H2), lambda: (0, 0)),
        ],
        out_specs=pl.BlockSpec((B, F, H2), lambda: (0, 0, 0)),
        grid=(),
    )(x2d, wih1_t, whh1_t, b1, wih2_t, whh2_t, b2, wfc, bfc)

    logit = jnp.transpose(out, (0, 2, 1))                      # (B, H2, F)
    return jnp.squeeze(logit)                                  # torch .squeeze()


@functools.partial(jax.jit, static_argnames=())
def lstm_model_forward(x, params):
    return lstm_model_forward_pallas(x, params)


# ---------------------------------------------------------------------------
# Pure-JAX reference (sanity check of the fused Pallas kernel).
# ---------------------------------------------------------------------------
def _lstm_layer_ref(x, w_ih, w_hh, b_ih, b_hh):
    T, B, _ = x.shape
    H = w_hh.shape[1]

    def step(carry, x_t):
        h, c = carry
        gates = x_t @ w_ih.T + b_ih + h @ w_hh.T + b_hh
        i, f, g, o = jnp.split(gates, 4, axis=-1)
        i, f, o = jax.nn.sigmoid(i), jax.nn.sigmoid(f), jax.nn.sigmoid(o)
        g = jnp.tanh(g)
        c = f * c + i * g
        h = o * jnp.tanh(c)
        return (h, c), h

    init = (jnp.zeros((B, H), jnp.float32), jnp.zeros((B, H), jnp.float32))
    _, hs = jax.lax.scan(step, init, x)
    return hs


def _model_ref(x, p):
    h1 = _lstm_layer_ref(x, p["w_ih1"], p["w_hh1"], p["b_ih1"], p["b_hh1"])
    h2 = _lstm_layer_ref(h1, p["w_ih2"], p["w_hh2"], p["b_ih2"], p["b_hh2"])
    h2 = jnp.transpose(h2, (1, 2, 0))                          # (B, H2, T)
    y = h2 @ p["w_fc"].T + p["b_fc"]
    return jax.nn.relu(jnp.squeeze(y))


def init_params(key, input_size, hidden1, hidden2, seq_len, fc_out):
    """Deterministic init, PyTorch-style uniform(-1/sqrt(H), 1/sqrt(H))."""
    ks = jax.random.split(key, 11)

    def u(k, shape, bound):
        return jax.random.uniform(k, shape, jnp.float32, -bound, bound)

    b1 = 1.0 / np.sqrt(hidden1)
    b2 = 1.0 / np.sqrt(hidden2)
    bf = 1.0 / np.sqrt(seq_len)
    return {
        "w_ih1": u(ks[0], (4 * hidden1, input_size), b1),
        "w_hh1": u(ks[1], (4 * hidden1, hidden1), b1),
        "b_ih1": u(ks[2], (4 * hidden1,), b1),
        "b_hh1": u(ks[3], (4 * hidden1,), b1),
        "w_ih2": u(ks[4], (4 * hidden2, hidden1), b2),
        "w_hh2": u(ks[5], (4 * hidden2, hidden2), b2),
        "b_ih2": u(ks[6], (4 * hidden2,), b2),
        "b_hh2": u(ks[7], (4 * hidden2,), b2),
        "w_fc": u(ks[8], (fc_out, seq_len), bf),
        "b_fc": u(ks[9], (fc_out,), bf),
    }


if __name__ == "__main__":
    # Small shapes consistent with the module.
    T = 8            # time steps
    B = 2            # batch
    INPUT = 16       # "seq_length" ctor arg == nn.LSTM input_size
    H1 = 32          # hidden_size
    H2 = 32          # opt.hidden_size2
    FC = 4           # opt.fc

    key = jax.random.PRNGKey(0)
    kx, kp = jax.random.split(key)
    x = jax.random.normal(kx, (T, B, INPUT), jnp.float32)
    params = init_params(kp, INPUT, H1, H2, T, FC)

    out = lstm_model_forward(x, params)
    out = jax.block_until_ready(out)

    ref = jax.block_until_ready(_model_ref(x, params))
    np.testing.assert_allclose(np.asarray(out), np.asarray(ref),
                               rtol=1e-4, atol=1e-4)

    print("KERNEL_OK")
</pallas_src>

<mosaic_0001>
module attributes {stable_mosaic.version = 11 : i64} {
  func.func @_lstm_model_kernel(%arg0: memref<16x16xf32, #tpu.memory_space<vmem>>, %arg1: memref<16x128xf32, #tpu.memory_space<vmem>>, %arg2: memref<32x128xf32, #tpu.memory_space<vmem>>, %arg3: memref<1x128xf32, #tpu.memory_space<vmem>>, %arg4: memref<32x128xf32, #tpu.memory_space<vmem>>, %arg5: memref<32x128xf32, #tpu.memory_space<vmem>>, %arg6: memref<1x128xf32, #tpu.memory_space<vmem>>, %arg7: memref<4x8xf32, #tpu.memory_space<vmem>>, %arg8: memref<4x32xf32, #tpu.memory_space<vmem>>, %arg9: memref<2x4x32xf32, #tpu.memory_space<vmem>>) attributes {dimension_semantics = [], scalar_prefetch = 0 : i64, scratch_operands = 0 : i64, tpu.core_type = #tpu.core_type<tc>} {
    %c0 = arith.constant 0 : index
    %c0_0 = arith.constant 0 : index
    %0 = vector.load %arg0[%c0, %c0_0] : memref<16x16xf32, #tpu.memory_space<vmem>>, vector<16x16xf32>
    %c0_1 = arith.constant 0 : index
    %c0_2 = arith.constant 0 : index
    %1 = vector.load %arg1[%c0_1, %c0_2] : memref<16x128xf32, #tpu.memory_space<vmem>>, vector<16x128xf32>
    %cst = arith.constant dense<0.000000e+00> : vector<16x128xf32>
    %2 = tpu.matmul %0, %1, %cst {dimension_numbers = #tpu.dot_dimension_numbers<[1], [0], [0], [1], [0, 0, 1, 1], [], []>} : vector<16x16xf32>, vector<16x128xf32>, vector<16x128xf32> -> vector<16x128xf32>
    %c0_3 = arith.constant 0 : index
    %c0_4 = arith.constant 0 : index
    %3 = vector.load %arg3[%c0_3, %c0_4] : memref<1x128xf32, #tpu.memory_space<vmem>>, vector<1x128xf32>
    %4 = vector.broadcast %3 : vector<1x128xf32> to vector<16x128xf32>
    %5 = arith.addf %2, %4 : vector<16x128xf32>
    %c0_5 = arith.constant 0 : index
    %c0_6 = arith.constant 0 : index
    %6 = vector.load %arg2[%c0_5, %c0_6] : memref<32x128xf32, #tpu.memory_space<vmem>>, vector<32x128xf32>
    %cst_7 = arith.constant 0.000000e+00 : f32
    %7 = vector.broadcast %cst_7 : f32 to vector<2x32xf32>
    %cst_8 = arith.constant 0.000000e+00 : f32
    %8 = vector.broadcast %cst_8 : f32 to vector<2x32xf32>
    %9 = vector.extract_strided_slice %5 {offsets = [0, 0], sizes = [2, 128], strides = [1, 1]} : vector<16x128xf32> to vector<2x128xf32>
    %cst_9 = arith.constant dense<0.000000e+00> : vector<2x128xf32>
    %10 = tpu.matmul %7, %6, %cst_9 {dimension_numbers = #tpu.dot_dimension_numbers<[1], [0], [0], [1], [0, 0, 1, 1], [], []>} : vector<2x32xf32>, vector<32x128xf32>, vector<2x128xf32> -> vector<2x128xf32>
    %11 = arith.addf %9, %10 : vector<2x128xf32>
    %12 = vector.extract_strided_slice %11 {offsets = [0, 0], sizes = [2, 32], strides = [1, 1]} : vector<2x128xf32> to vector<2x32xf32>
    %13 = arith.negf %12 : vector<2x32xf32>
    %14 = math.exp %13 : vector<2x32xf32>
    %cst_10 = arith.constant 1.000000e+00 : f32
    %15 = vector.broadcast %cst_10 : f32 to vector<2x32xf32>
    %16 = arith.addf %15, %14 : vector<2x32xf32>
    %17 = arith.divf %15, %16 : vector<2x32xf32>
    %18 = vector.extract_strided_slice %11 {offsets = [0, 32], sizes = [2, 32], strides = [1, 1]} : vector<2x128xf32> to vector<2x32xf32>
    %19 = arith.negf %18 : vector<2x32xf32>
    %20 = math.exp %19 : vector<2x32xf32>
    %cst_11 = arith.constant 1.000000e+00 : f32
    %21 = vector.broadcast %cst_11 : f32 to vector<2x32xf32>
    %22 = arith.addf %21, %20 : vector<2x32xf32>
    %23 = arith.divf %21, %22 : vector<2x32xf32>
    %24 = vector.extract_strided_slice %11 {offsets = [0, 64], sizes = [2, 32], strides = [1, 1]} : vector<2x128xf32> to vector<2x32xf32>
    %25 = math.tanh %24 : vector<2x32xf32>
    %26 = vector.extract_strided_slice %11 {offsets = [0, 96], sizes = [2, 32], strides = [1, 1]} : vector<2x128xf32> to vector<2x32xf32>
    %27 = arith.negf %26 : vector<2x32xf32>
    %28 = math.exp %27 : vector<2x32xf32>
    %cst_12 = arith.constant 1.000000e+00 : f32
    %29 = vector.broadcast %cst_12 : f32 to vector<2x32xf32>
    %30 = arith.addf %29, %28 : vector<2x32xf32>
    %31 = arith.divf %29, %30 : vector<2x32xf32>
    %32 = arith.mulf %23, %8 : vector<2x32xf32>
    %33 = arith.mulf %17, %25 : vector<2x32xf32>
    %34 = arith.addf %32, %33 : vector<2x32xf32>
    %35 = math.tanh %34 : vector<2x32xf32>
    %36 = arith.mulf %31, %35 : vector<2x32xf32>
    %37 = vector.extract_strided_slice %5 {offsets = [2, 0], sizes = [2, 128], strides = [1, 1]} : vector<16x128xf32> to vector<2x128xf32>
    %cst_13 = arith.constant dense<0.000000e+00> : vector<2x128xf32>
    %38 = tpu.matmul %36, %6, %cst_13 {dimension_numbers = #tpu.dot_dimension_numbers<[1], [0], [0], [1], [0, 0, 1, 1], [], []>} : vector<2x32xf32>, vector<32x128xf32>, vector<2x128xf32> -> vector<2x128xf32>
    %39 = arith.addf %37, %38 : vector<2x128xf32>
    %40 = vector.extract_strided_slice %39 {offsets = [0, 0], sizes = [2, 32], strides = [1, 1]} : vector<2x128xf32> to vector<2x32xf32>
    %41 = arith.negf %40 : vector<2x32xf32>
    %42 = math.exp %41 : vector<2x32xf32>
    %cst_14 = arith.constant 1.000000e+00 : f32
    %43 = vector.broadcast %cst_14 : f32 to vector<2x32xf32>
    %44 = arith.addf %43, %42 : vector<2x32xf32>
    %45 = arith.divf %43, %44 : vector<2x32xf32>
    %46 = vector.extract_strided_slice %39 {offsets = [0, 32], sizes = [2, 32], strides = [1, 1]} : vector<2x128xf32> to vector<2x32xf32>
    %47 = arith.negf %46 : vector<2x32xf32>
    %48 = math.exp %47 : vector<2x32xf32>
    %cst_15 = arith.constant 1.000000e+00 : f32
    %49 = vector.broadcast %cst_15 : f32 to vector<2x32xf32>
    %50 = arith.addf %49, %48 : vector<2x32xf32>
    %51 = arith.divf %49, %50 : vector<2x32xf32>
    %52 = vector.extract_strided_slice %39 {offsets = [0, 64], sizes = [2, 32], strides = [1, 1]} : vector<2x128xf32> to vector<2x32xf32>
    %53 = math.tanh %52 : vector<2x32xf32>
    %54 = vector.extract_strided_slice %39 {offsets = [0, 96], sizes = [2, 32], strides = [1, 1]} : vector<2x128xf32> to vector<2x32xf32>
    %55 = arith.negf %54 : vector<2x32xf32>
    %56 = math.exp %55 : vector<2x32xf32>
    %cst_16 = arith.constant 1.000000e+00 : f32
    %57 = vector.broadcast %cst_16 : f32 to vector<2x32xf32>
    %58 = arith.addf %57, %56 : vector<2x32xf32>
    %59 = arith.divf %57, %58 : vector<2x32xf32>
    %60 = arith.mulf %51, %34 : vector<2x32xf32>
    %61 = arith.mulf %45, %53 : vector<2x32xf32>
    %62 = arith.addf %60, %61 : vector<2x32xf32>
    %63 = math.tanh %62 : vector<2x32xf32>
    %64 = arith.mulf %59, %63 : vector<2x32xf32>
    %65 = vector.extract_strided_slice %5 {offsets = [4, 0], sizes = [2, 128], strides = [1, 1]} : vector<16x128xf32> to vector<2x128xf32>
    %cst_17 = arith.constant dense<0.000000e+00> : vector<2x128xf32>
    %66 = tpu.matmul %64, %6, %cst_17 {dimension_numbers = #tpu.dot_dimension_numbers<[1], [0], [0], [1], [0, 0, 1, 1], [], []>} : vector<2x32xf32>, vector<32x128xf32>, vector<2x128xf32> -> vector<2x128xf32>
    %67 = arith.addf %65, %66 : vector<2x128xf32>
    %68 = vector.extract_strided_slice %67 {offsets = [0, 0], sizes = [2, 32], strides = [1, 1]} : vector<2x128xf32> to vector<2x32xf32>
    %69 = arith.negf %68 : vector<2x32xf32>
    %70 = math.exp %69 : vector<2x32xf32>
    %cst_18 = arith.constant 1.000000e+00 : f32
    %71 = vector.broadcast %cst_18 : f32 to vector<2x32xf32>
    %72 = arith.addf %71, %70 : vector<2x32xf32>
    %73 = arith.divf %71, %72 : vector<2x32xf32>
    %74 = vector.extract_strided_slice %67 {offsets = [0, 32], sizes = [2, 32], strides = [1, 1]} : vector<2x128xf32> to vector<2x32xf32>
    %75 = arith.negf %74 : vector<2x32xf32>
    %76 = math.exp %75 : vector<2x32xf32>
    %cst_19 = arith.constant 1.000000e+00 : f32
    %77 = vector.broadcast %cst_19 : f32 to vector<2x32xf32>
    %78 = arith.addf %77, %76 : vector<2x32xf32>
    %79 = arith.divf %77, %78 : vector<2x32xf32>
    %80 = vector.extract_strided_slice %67 {offsets = [0, 64], sizes = [2, 32], strides = [1, 1]} : vector<2x128xf32> to vector<2x32xf32>
    %81 = math.tanh %80 : vector<2x32xf32>
    %82 = vector.extract_strided_slice %67 {offsets = [0, 96], sizes = [2, 32], strides = [1, 1]} : vector<2x128xf32> to vector<2x32xf32>
    %83 = arith.negf %82 : vector<2x32xf32>
    %84 = math.exp %83 : vector<2x32xf32>
    %cst_20 = arith.constant 1.000000e+00 : f32
    %85 = vector.broadcast %cst_20 : f32 to vector<2x32xf32>
    %86 = arith.addf %85, %84 : vector<2x32xf32>
    %87 = arith.divf %85, %86 : vector<2x32xf32>
    %88 = arith.mulf %79, %62 : vector<2x32xf32>
    %89 = arith.mulf %73, %81 : vector<2x32xf32>
    %90 = arith.addf %88, %89 : vector<2x32xf32>
    %91 = math.tanh %90 : vector<2x32xf32>
    %92 = arith.mulf %87, %91 : vector<2x32xf32>
    %93 = vector.extract_strided_slice %5 {offsets = [6, 0], sizes = [2, 128], strides = [1, 1]} : vector<16x128xf32> to vector<2x128xf32>
    %cst_21 = arith.constant dense<0.000000e+00> : vector<2x128xf32>
    %94 = tpu.matmul %92, %6, %cst_21 {dimension_numbers = #tpu.dot_dimension_numbers<[1], [0], [0], [1], [0, 0, 1, 1], [], []>} : vector<2x32xf32>, vector<32x128xf32>, vector<2x128xf32> -> vector<2x128xf32>
    %95 = arith.addf %93, %94 : vector<2x128xf32>
    %96 = vector.extract_strided_slice %95 {offsets = [0, 0], sizes = [2, 32], strides = [1, 1]} : vector<2x128xf32> to vector<2x32xf32>
    %97 = arith.negf %96 : vector<2x32xf32>
    %98 = math.exp %97 : vector<2x32xf32>
    %cst_22 = arith.constant 1.000000e+00 : f32
    %99 = vector.broadcast %cst_22 : f32 to vector<2x32xf32>
    %100 = arith.addf %99, %98 : vector<2x32xf32>
    %101 = arith.divf %99, %100 : vector<2x32xf32>
    %102 = vector.extract_strided_slice %95 {offsets = [0, 32], sizes = [2, 32], strides = [1, 1]} : vector<2x128xf32> to vector<2x32xf32>
    %103 = arith.negf %102 : vector<2x32xf32>
    %104 = math.exp %103 : vector<2x32xf32>
    %cst_23 = arith.constant 1.000000e+00 : f32
    %105 = vector.broadcast %cst_23 : f32 to vector<2x32xf32>
    %106 = arith.addf %105, %104 : vector<2x32xf32>
    %107 = arith.divf %105, %106 : vector<2x32xf32>
    %108 = vector.extract_strided_slice %95 {offsets = [0, 64], sizes = [2, 32], strides = [1, 1]} : vector<2x128xf32> to vector<2x32xf32>
    %109 = math.tanh %108 : vector<2x32xf32>
    %110 = vector.extract_strided_slice %95 {offsets = [0, 96], sizes = [2, 32], strides = [1, 1]} : vector<2x128xf32> to vector<2x32xf32>
    %111 = arith.negf %110 : vector<2x32xf32>
    %112 = math.exp %111 : vector<2x32xf32>
    %cst_24 = arith.constant 1.000000e+00 : f32
    %113 = vector.broadcast %cst_24 : f32 to vector<2x32xf32>
    %114 = arith.addf %113, %112 : vector<2x32xf32>
    %115 = arith.divf %113, %114 : vector<2x32xf32>
    %116 = arith.mulf %107, %90 : vector<2x32xf32>
    %117 = arith.mulf %101, %109 : vector<2x32xf32>
    %118 = arith.addf %116, %117 : vector<2x32xf32>
    %119 = math.tanh %118 : vector<2x32xf32>
    %120 = arith.mulf %115, %119 : vector<2x32xf32>
    %121 = vector.extract_strided_slice %5 {offsets = [8, 0], sizes = [2, 128], strides = [1, 1]} : vector<16x128xf32> to vector<2x128xf32>
    %cst_25 = arith.constant dense<0.000000e+00> : vector<2x128xf32>
    %122 = tpu.matmul %120, %6, %cst_25 {dimension_numbers = #tpu.dot_dimension_numbers<[1], [0], [0], [1], [0, 0, 1, 1], [], []>} : vector<2x32xf32>, vector<32x128xf32>, vector<2x128xf32> -> vector<2x128xf32>
    %123 = arith.addf %121, %122 : vector<2x128xf32>
    %124 = vector.extract_strided_slice %123 {offsets = [0, 0], sizes = [2, 32], strides = [1, 1]} : vector<2x128xf32> to vector<2x32xf32>
    %125 = arith.negf %124 : vector<2x32xf32>
    %126 = math.exp %125 : vector<2x32xf32>
    %cst_26 = arith.constant 1.000000e+00 : f32
    %127 = vector.broadcast %cst_26 : f32 to vector<2x32xf32>
    %128 = arith.addf %127, %126 : vector<2x32xf32>
    %129 = arith.divf %127, %128 : vector<2x32xf32>
    %130 = vector.extract_strided_slice %123 {offsets = [0, 32], sizes = [2, 32], strides = [1, 1]} : vector<2x128xf32> to vector<2x32xf32>
    %131 = arith.negf %130 : vector<2x32xf32>
    %132 = math.exp %131 : vector<2x32xf32>
    %cst_27 = arith.constant 1.000000e+00 : f32
    %133 = vector.broadcast %cst_27 : f32 to vector<2x32xf32>
    %134 = arith.addf %133, %132 : vector<2x32xf32>
    %135 = arith.divf %133, %134 : vector<2x32xf32>
    %136 = vector.extract_strided_slice %123 {offsets = [0, 64], sizes = [2, 32], strides = [1, 1]} : vector<2x128xf32> to vector<2x32xf32>
    %137 = math.tanh %136 : vector<2x32xf32>
    %138 = vector.extract_strided_slice %123 {offsets = [0, 96], sizes = [2, 32], strides = [1, 1]} : vector<2x128xf32> to vector<2x32xf32>
    %139 = arith.negf %138 : vector<2x32xf32>
    %140 = math.exp %139 : vector<2x32xf32>
    %cst_28 = arith.constant 1.000000e+00 : f32
    %141 = vector.broadcast %cst_28 : f32 to vector<2x32xf32>
    %142 = arith.addf %141, %140 : vector<2x32xf32>
    %143 = arith.divf %141, %142 : vector<2x32xf32>
    %144 = arith.mulf %135, %118 : vector<2x32xf32>
    %145 = arith.mulf %129, %137 : vector<2x32xf32>
    %146 = arith.addf %144, %145 : vector<2x32xf32>
    %147 = math.tanh %146 : vector<2x32xf32>
    %148 = arith.mulf %143, %147 : vector<2x32xf32>
    %149 = vector.extract_strided_slice %5 {offsets = [10, 0], sizes = [2, 128], strides = [1, 1]} : vector<16x128xf32> to vector<2x128xf32>
    %cst_29 = arith.constant dense<0.000000e+00> : vector<2x128xf32>
    %150 = tpu.matmul %148, %6, %cst_29 {dimension_numbers = #tpu.dot_dimension_numbers<[1], [0], [0], [1], [0, 0, 1, 1], [], []>} : vector<2x32xf32>, vector<32x128xf32>, vector<2x128xf32> -> vector<2x128xf32>
    %151 = arith.addf %149, %150 : vector<2x128xf32>
    %152 = vector.extract_strided_slice %151 {offsets = [0, 0], sizes = [2, 32], strides = [1, 1]} : vector<2x128xf32> to vector<2x32xf32>
    %153 = arith.negf %152 : vector<2x32xf32>
    %154 = math.exp %153 : vector<2x32xf32>
    %cst_30 = arith.constant 1.000000e+00 : f32
    %155 = vector.broadcast %cst_30 : f32 to vector<2x32xf32>
    %156 = arith.addf %155, %154 : vector<2x32xf32>
    %157 = arith.divf %155, %156 : vector<2x32xf32>
    %158 = vector.extract_strided_slice %151 {offsets = [0, 32], sizes = [2, 32], strides = [1, 1]} : vector<2x128xf32> to vector<2x32xf32>
    %159 = arith.negf %158 : vector<2x32xf32>
    %160 = math.exp %159 : vector<2x32xf32>
    %cst_31 = arith.constant 1.000000e+00 : f32
    %161 = vector.broadcast %cst_31 : f32 to vector<2x32xf32>
    %162 = arith.addf %161, %160 : vector<2x32xf32>
    %163 = arith.divf %161, %162 : vector<2x32xf32>
    %164 = vector.extract_strided_slice %151 {offsets = [0, 64], sizes = [2, 32], strides = [1, 1]} : vector<2x128xf32> to vector<2x32xf32>
    %165 = math.tanh %164 : vector<2x32xf32>
    %166 = vector.extract_strided_slice %151 {offsets = [0, 96], sizes = [2, 32], strides = [1, 1]} : vector<2x128xf32> to vector<2x32xf32>
    %167 = arith.negf %166 : vector<2x32xf32>
    %168 = math.exp %167 : vector<2x32xf32>
    %cst_32 = arith.constant 1.000000e+00 : f32
    %169 = vector.broadcast %cst_32 : f32 to vector<2x32xf32>
    %170 = arith.addf %169, %168 : vector<2x32xf32>
    %171 = arith.divf %169, %170 : vector<2x32xf32>
    %172 = arith.mulf %163, %146 : vector<2x32xf32>
    %173 = arith.mulf %157, %165 : vector<2x32xf32>
    %174 = arith.addf %172, %173 : vector<2x32xf32>
    %175 = math.tanh %174 : vector<2x32xf32>
    %176 = arith.mulf %171, %175 : vector<2x32xf32>
    %177 = vector.extract_strided_slice %5 {offsets = [12, 0], sizes = [2, 128], strides = [1, 1]} : vector<16x128xf32> to vector<2x128xf32>
    %cst_33 = arith.constant dense<0.000000e+00> : vector<2x128xf32>
    %178 = tpu.matmul %176, %6, %cst_33 {dimension_numbers = #tpu.dot_dimension_numbers<[1], [0], [0], [1], [0, 0, 1, 1], [], []>} : vector<2x32xf32>, vector<32x128xf32>, vector<2x128xf32> -> vector<2x128xf32>
    %179 = arith.addf %177, %178 : vector<2x128xf32>
    %180 = vector.extract_strided_slice %179 {offsets = [0, 0], sizes = [2, 32], strides = [1, 1]} : vector<2x128xf32> to vector<2x32xf32>
    %181 = arith.negf %180 : vector<2x32xf32>
    %182 = math.exp %181 : vector<2x32xf32>
    %cst_34 = arith.constant 1.000000e+00 : f32
    %183 = vector.broadcast %cst_34 : f32 to vector<2x32xf32>
    %184 = arith.addf %183, %182 : vector<2x32xf32>
    %185 = arith.divf %183, %184 : vector<2x32xf32>
    %186 = vector.extract_strided_slice %179 {offsets = [0, 32], sizes = [2, 32], strides = [1, 1]} : vector<2x128xf32> to vector<2x32xf32>
    %187 = arith.negf %186 : vector<2x32xf32>
    %188 = math.exp %187 : vector<2x32xf32>
    %cst_35 = arith.constant 1.000000e+00 : f32
    %189 = vector.broadcast %cst_35 : f32 to vector<2x32xf32>
    %190 = arith.addf %189, %188 : vector<2x32xf32>
    %191 = arith.divf %189, %190 : vector<2x32xf32>
    %192 = vector.extract_strided_slice %179 {offsets = [0, 64], sizes = [2, 32], strides = [1, 1]} : vector<2x128xf32> to vector<2x32xf32>
    %193 = math.tanh %192 : vector<2x32xf32>
    %194 = vector.extract_strided_slice %179 {offsets = [0, 96], sizes = [2, 32], strides = [1, 1]} : vector<2x128xf32> to vector<2x32xf32>
    %195 = arith.negf %194 : vector<2x32xf32>
    %196 = math.exp %195 : vector<2x32xf32>
    %cst_36 = arith.constant 1.000000e+00 : f32
    %197 = vector.broadcast %cst_36 : f32 to vector<2x32xf32>
    %198 = arith.addf %197, %196 : vector<2x32xf32>
    %199 = arith.divf %197, %198 : vector<2x32xf32>
    %200 = arith.mulf %191, %174 : vector<2x32xf32>
    %201 = arith.mulf %185, %193 : vector<2x32xf32>
    %202 = arith.addf %200, %201 : vector<2x32xf32>
    %203 = math.tanh %202 : vector<2x32xf32>
    %204 = arith.mulf %199, %203 : vector<2x32xf32>
    %205 = vector.extract_strided_slice %5 {offsets = [14, 0], sizes = [2, 128], strides = [1, 1]} : vector<16x128xf32> to vector<2x128xf32>
    %cst_37 = arith.constant dense<0.000000e+00> : vector<2x128xf32>
    %206 = tpu.matmul %204, %6, %cst_37 {dimension_numbers = #tpu.dot_dimension_numbers<[1], [0], [0], [1], [0, 0, 1, 1], [], []>} : vector<2x32xf32>, vector<32x128xf32>, vector<2x128xf32> -> vector<2x128xf32>
    %207 = arith.addf %205, %206 : vector<2x128xf32>
    %208 = vector.extract_strided_slice %207 {offsets = [0, 0], sizes = [2, 32], strides = [1, 1]} : vector<2x128xf32> to vector<2x32xf32>
    %209 = arith.negf %208 : vector<2x32xf32>
    %210 = math.exp %209 : vector<2x32xf32>
    %cst_38 = arith.constant 1.000000e+00 : f32
    %211 = vector.broadcast %cst_38 : f32 to vector<2x32xf32>
    %212 = arith.addf %211, %210 : vector<2x32xf32>
    %213 = arith.divf %211, %212 : vector<2x32xf32>
    %214 = vector.extract_strided_slice %207 {offsets = [0, 32], sizes = [2, 32], strides = [1, 1]} : vector<2x128xf32> to vector<2x32xf32>
    %215 = arith.negf %214 : vector<2x32xf32>
    %216 = math.exp %215 : vector<2x32xf32>
    %cst_39 = arith.constant 1.000000e+00 : f32
    %217 = vector.broadcast %cst_39 : f32 to vector<2x32xf32>
    %218 = arith.addf %217, %216 : vector<2x32xf32>
    %219 = arith.divf %217, %218 : vector<2x32xf32>
    %220 = vector.extract_strided_slice %207 {offsets = [0, 64], sizes = [2, 32], strides = [1, 1]} : vector<2x128xf32> to vector<2x32xf32>
    %221 = math.tanh %220 : vector<2x32xf32>
    %222 = vector.extract_strided_slice %207 {offsets = [0, 96], sizes = [2, 32], strides = [1, 1]} : vector<2x128xf32> to vector<2x32xf32>
    %223 = arith.negf %222 : vector<2x32xf32>
    %224 = math.exp %223 : vector<2x32xf32>
    %cst_40 = arith.constant 1.000000e+00 : f32
    %225 = vector.broadcast %cst_40 : f32 to vector<2x32xf32>
    %226 = arith.addf %225, %224 : vector<2x32xf32>
    %227 = arith.divf %225, %226 : vector<2x32xf32>
    %228 = arith.mulf %219, %202 : vector<2x32xf32>
    %229 = arith.mulf %213, %221 : vector<2x32xf32>
    %230 = arith.addf %228, %229 : vector<2x32xf32>
    %231 = math.tanh %230 : vector<2x32xf32>
    %232 = arith.mulf %227, %231 : vector<2x32xf32>
    %233 = tpu.concatenate %36, %64, %92, %120, %148, %176, %204, %232 in 0 : vector<2x32xf32>, vector<2x32xf32>, vector<2x32xf32>, vector<2x32xf32>, vector<2x32xf32>, vector<2x32xf32>, vector<2x32xf32>, vector<2x32xf32> -> vector<16x32xf32>
    %c0_41 = arith.constant 0 : index
    %c0_42 = arith.constant 0 : index
    %234 = vector.load %arg4[%c0_41, %c0_42] : memref<32x128xf32, #tpu.memory_space<vmem>>, vector<32x128xf32>
    %cst_43 = arith.constant dense<0.000000e+00> : vector<16x128xf32>
    %235 = tpu.matmul %233, %234, %cst_43 {dimension_numbers = #tpu.dot_dimension_numbers<[1], [0], [0], [1], [0, 0, 1, 1], [], []>} : vector<16x32xf32>, vector<32x128xf32>, vector<16x128xf32> -> vector<16x128xf32>
    %c0_44 = arith.constant 0 : index
    %c0_45 = arith.constant 0 : index
    %236 = vector.load %arg6[%c0_44, %c0_45] : memref<1x128xf32, #tpu.memory_space<vmem>>, vector<1x128xf32>
    %237 = vector.broadcast %236 : vector<1x128xf32> to vector<16x128xf32>
    %238 = arith.addf %235, %237 : vector<16x128xf32>
    %c0_46 = arith.constant 0 : index
    %c0_47 = arith.constant 0 : index
    %239 = vector.load %arg5[%c0_46, %c0_47] : memref<32x128xf32, #tpu.memory_space<vmem>>, vector<32x128xf32>
    %cst_48 = arith.constant 0.000000e+00 : f32
    %240 = vector.broadcast %cst_48 : f32 to vector<2x32xf32>
    %cst_49 = arith.constant 0.000000e+00 : f32
    %241 = vector.broadcast %cst_49 : f32 to vector<2x32xf32>
    %242 = vector.extract_strided_slice %238 {offsets = [0, 0], sizes = [2, 128], strides = [1, 1]} : vector<16x128xf32> to vector<2x128xf32>
    %cst_50 = arith.constant dense<0.000000e+00> : vector<2x128xf32>
    %243 = tpu.matmul %240, %239, %cst_50 {dimension_numbers = #tpu.dot_dimension_numbers<[1], [0], [0], [1], [0, 0, 1, 1], [], []>} : vector<2x32xf32>, vector<32x128xf32>, vector<2x128xf32> -> vector<2x128xf32>
    %244 = arith.addf %242, %243 : vector<2x128xf32>
    %245 = vector.extract_strided_slice %244 {offsets = [0, 0], sizes = [2, 32], strides = [1, 1]} : vector<2x128xf32> to vector<2x32xf32>
    %246 = arith.negf %245 : vector<2x32xf32>
    %247 = math.exp %246 : vector<2x32xf32>
    %cst_51 = arith.constant 1.000000e+00 : f32
    %248 = vector.broadcast %cst_51 : f32 to vector<2x32xf32>
    %249 = arith.addf %248, %247 : vector<2x32xf32>
    %250 = arith.divf %248, %249 : vector<2x32xf32>
    %251 = vector.extract_strided_slice %244 {offsets = [0, 32], sizes = [2, 32], strides = [1, 1]} : vector<2x128xf32> to vector<2x32xf32>
    %252 = arith.negf %251 : vector<2x32xf32>
    %253 = math.exp %252 : vector<2x32xf32>
    %cst_52 = arith.constant 1.000000e+00 : f32
    %254 = vector.broadcast %cst_52 : f32 to vector<2x32xf32>
    %255 = arith.addf %254, %253 : vector<2x32xf32>
    %256 = arith.divf %254, %255 : vector<2x32xf32>
    %257 = vector.extract_strided_slice %244 {offsets = [0, 64], sizes = [2, 32], strides = [1, 1]} : vector<2x128xf32> to vector<2x32xf32>
    %258 = math.tanh %257 : vector<2x32xf32>
    %259 = vector.extract_strided_slice %244 {offsets = [0, 96], sizes = [2, 32], strides = [1, 1]} : vector<2x128xf32> to vector<2x32xf32>
    %260 = arith.negf %259 : vector<2x32xf32>
    %261 = math.exp %260 : vector<2x32xf32>
    %cst_53 = arith.constant 1.000000e+00 : f32
    %262 = vector.broadcast %cst_53 : f32 to vector<2x32xf32>
    %263 = arith.addf %262, %261 : vector<2x32xf32>
    %264 = arith.divf %262, %263 : vector<2x32xf32>
    %265 = arith.mulf %256, %241 : vector<2x32xf32>
    %266 = arith.mulf %250, %258 : vector<2x32xf32>
    %267 = arith.addf %265, %266 : vector<2x32xf32>
    %268 = math.tanh %267 : vector<2x32xf32>
    %269 = arith.mulf %264, %268 : vector<2x32xf32>
    %270 = vector.extract_strided_slice %238 {offsets = [2, 0], sizes = [2, 128], strides = [1, 1]} : vector<16x128xf32> to vector<2x128xf32>
    %cst_54 = arith.constant dense<0.000000e+00> : vector<2x128xf32>
    %271 = tpu.matmul %269, %239, %cst_54 {dimension_numbers = #tpu.dot_dimension_numbers<[1], [0], [0], [1], [0, 0, 1, 1], [], []>} : vector<2x32xf32>, vector<32x128xf32>, vector<2x128xf32> -> vector<2x128xf32>
    %272 = arith.addf %270, %271 : vector<2x128xf32>
    %273 = vector.extract_strided_slice %272 {offsets = [0, 0], sizes = [2, 32], strides = [1, 1]} : vector<2x128xf32> to vector<2x32xf32>
    %274 = arith.negf %273 : vector<2x32xf32>
    %275 = math.exp %274 : vector<2x32xf32>
    %cst_55 = arith.constant 1.000000e+00 : f32
    %276 = vector.broadcast %cst_55 : f32 to vector<2x32xf32>
    %277 = arith.addf %276, %275 : vector<2x32xf32>
    %278 = arith.divf %276, %277 : vector<2x32xf32>
    %279 = vector.extract_strided_slice %272 {offsets = [0, 32], sizes = [2, 32], strides = [1, 1]} : vector<2x128xf32> to vector<2x32xf32>
    %280 = arith.negf %279 : vector<2x32xf32>
    %281 = math.exp %280 : vector<2x32xf32>
    %cst_56 = arith.constant 1.000000e+00 : f32
    %282 = vector.broadcast %cst_56 : f32 to vector<2x32xf32>
    %283 = arith.addf %282, %281 : vector<2x32xf32>
    %284 = arith.divf %282, %283 : vector<2x32xf32>
    %285 = vector.extract_strided_slice %272 {offsets = [0, 64], sizes = [2, 32], strides = [1, 1]} : vector<2x128xf32> to vector<2x32xf32>
    %286 = math.tanh %285 : vector<2x32xf32>
    %287 = vector.extract_strided_slice %272 {offsets = [0, 96], sizes = [2, 32], strides = [1, 1]} : vector<2x128xf32> to vector<2x32xf32>
    %288 = arith.negf %287 : vector<2x32xf32>
    %289 = math.exp %288 : vector<2x32xf32>
    %cst_57 = arith.constant 1.000000e+00 : f32
    %290 = vector.broadcast %cst_57 : f32 to vector<2x32xf32>
    %291 = arith.addf %290, %289 : vector<2x32xf32>
    %292 = arith.divf %290, %291 : vector<2x32xf32>
    %293 = arith.mulf %284, %267 : vector<2x32xf32>
    %294 = arith.mulf %278, %286 : vector<2x32xf32>
    %295 = arith.addf %293, %294 : vector<2x32xf32>
    %296 = math.tanh %295 : vector<2x32xf32>
    %297 = arith.mulf %292, %296 : vector<2x32xf32>
    %298 = vector.extract_strided_slice %238 {offsets = [4, 0], sizes = [2, 128], strides = [1, 1]} : vector<16x128xf32> to vector<2x128xf32>
    %cst_58 = arith.constant dense<0.000000e+00> : vector<2x128xf32>
    %299 = tpu.matmul %297, %239, %cst_58 {dimension_numbers = #tpu.dot_dimension_numbers<[1], [0], [0], [1], [0, 0, 1, 1], [], []>} : vector<2x32xf32>, vector<32x128xf32>, vector<2x128xf32> -> vector<2x128xf32>
    %300 = arith.addf %298, %299 : vector<2x128xf32>
    %301 = vector.extract_strided_slice %300 {offsets = [0, 0], sizes = [2, 32], strides = [1, 1]} : vector<2x128xf32> to vector<2x32xf32>
    %302 = arith.negf %301 : vector<2x32xf32>
    %303 = math.exp %302 : vector<2x32xf32>
    %cst_59 = arith.constant 1.000000e+00 : f32
    %304 = vector.broadcast %cst_59 : f32 to vector<2x32xf32>
    %305 = arith.addf %304, %303 : vector<2x32xf32>
    %306 = arith.divf %304, %305 : vector<2x32xf32>
    %307 = vector.extract_strided_slice %300 {offsets = [0, 32], sizes = [2, 32], strides = [1, 1]} : vector<2x128xf32> to vector<2x32xf32>
    %308 = arith.negf %307 : vector<2x32xf32>
    %309 = math.exp %308 : vector<2x32xf32>
    %cst_60 = arith.constant 1.000000e+00 : f32
    %310 = vector.broadcast %cst_60 : f32 to vector<2x32xf32>
    %311 = arith.addf %310, %309 : vector<2x32xf32>
    %312 = arith.divf %310, %311 : vector<2x32xf32>
    %313 = vector.extract_strided_slice %300 {offsets = [0, 64], sizes = [2, 32], strides = [1, 1]} : vector<2x128xf32> to vector<2x32xf32>
    %314 = math.tanh %313 : vector<2x32xf32>
    %315 = vector.extract_strided_slice %300 {offsets = [0, 96], sizes = [2, 32], strides = [1, 1]} : vector<2x128xf32> to vector<2x32xf32>
    %316 = arith.negf %315 : vector<2x32xf32>
    %317 = math.exp %316 : vector<2x32xf32>
    %cst_61 = arith.constant 1.000000e+00 : f32
    %318 = vector.broadcast %cst_61 : f32 to vector<2x32xf32>
    %319 = arith.addf %318, %317 : vector<2x32xf32>
    %320 = arith.divf %318, %319 : vector<2x32xf32>
    %321 = arith.mulf %312, %295 : vector<2x32xf32>
    %322 = arith.mulf %306, %314 : vector<2x32xf32>
    %323 = arith.addf %321, %322 : vector<2x32xf32>
    %324 = math.tanh %323 : vector<2x32xf32>
    %325 = arith.mulf %320, %324 : vector<2x32xf32>
    %326 = vector.extract_strided_slice %238 {offsets = [6, 0], sizes = [2, 128], strides = [1, 1]} : vector<16x128xf32> to vector<2x128xf32>
    %cst_62 = arith.constant dense<0.000000e+00> : vector<2x128xf32>
    %327 = tpu.matmul %325, %239, %cst_62 {dimension_numbers = #tpu.dot_dimension_numbers<[1], [0], [0], [1], [0, 0, 1, 1], [], []>} : vector<2x32xf32>, vector<32x128xf32>, vector<2x128xf32> -> vector<2x128xf32>
    %328 = arith.addf %326, %327 : vector<2x128xf32>
    %329 = vector.extract_strided_slice %328 {offsets = [0, 0], sizes = [2, 32], strides = [1, 1]} : vector<2x128xf32> to vector<2x32xf32>
    %330 = arith.negf %329 : vector<2x32xf32>
    %331 = math.exp %330 : vector<2x32xf32>
    %cst_63 = arith.constant 1.000000e+00 : f32
    %332 = vector.broadcast %cst_63 : f32 to vector<2x32xf32>
    %333 = arith.addf %332, %331 : vector<2x32xf32>
    %334 = arith.divf %332, %333 : vector<2x32xf32>
    %335 = vector.extract_strided_slice %328 {offsets = [0, 32], sizes = [2, 32], strides = [1, 1]} : vector<2x128xf32> to vector<2x32xf32>
    %336 = arith.negf %335 : vector<2x32xf32>
    %337 = math.exp %336 : vector<2x32xf32>
    %cst_64 = arith.constant 1.000000e+00 : f32
    %338 = vector.broadcast %cst_64 : f32 to vector<2x32xf32>
    %339 = arith.addf %338, %337 : vector<2x32xf32>
    %340 = arith.divf %338, %339 : vector<2x32xf32>
    %341 = vector.extract_strided_slice %328 {offsets = [0, 64], sizes = [2, 32], strides = [1, 1]} : vector<2x128xf32> to vector<2x32xf32>
    %342 = math.tanh %341 : vector<2x32xf32>
    %343 = vector.extract_strided_slice %328 {offsets = [0, 96], sizes = [2, 32], strides = [1, 1]} : vector<2x128xf32> to vector<2x32xf32>
    %344 = arith.negf %343 : vector<2x32xf32>
    %345 = math.exp %344 : vector<2x32xf32>
    %cst_65 = arith.constant 1.000000e+00 : f32
    %346 = vector.broadcast %cst_65 : f32 to vector<2x32xf32>
    %347 = arith.addf %346, %345 : vector<2x32xf32>
    %348 = arith.divf %346, %347 : vector<2x32xf32>
    %349 = arith.mulf %340, %323 : vector<2x32xf32>
    %350 = arith.mulf %334, %342 : vector<2x32xf32>
    %351 = arith.addf %349, %350 : vector<2x32xf32>
    %352 = math.tanh %351 : vector<2x32xf32>
    %353 = arith.mulf %348, %352 : vector<2x32xf32>
    %354 = vector.extract_strided_slice %238 {offsets = [8, 0], sizes = [2, 128], strides = [1, 1]} : vector<16x128xf32> to vector<2x128xf32>
    %cst_66 = arith.constant dense<0.000000e+00> : vector<2x128xf32>
    %355 = tpu.matmul %353, %239, %cst_66 {dimension_numbers = #tpu.dot_dimension_numbers<[1], [0], [0], [1], [0, 0, 1, 1], [], []>} : vector<2x32xf32>, vector<32x128xf32>, vector<2x128xf32> -> vector<2x128xf32>
    %356 = arith.addf %354, %355 : vector<2x128xf32>
    %357 = vector.extract_strided_slice %356 {offsets = [0, 0], sizes = [2, 32], strides = [1, 1]} : vector<2x128xf32> to vector<2x32xf32>
    %358 = arith.negf %357 : vector<2x32xf32>
    %359 = math.exp %358 : vector<2x32xf32>
    %cst_67 = arith.constant 1.000000e+00 : f32
    %360 = vector.broadcast %cst_67 : f32 to vector<2x32xf32>
    %361 = arith.addf %360, %359 : vector<2x32xf32>
    %362 = arith.divf %360, %361 : vector<2x32xf32>
    %363 = vector.extract_strided_slice %356 {offsets = [0, 32], sizes = [2, 32], strides = [1, 1]} : vector<2x128xf32> to vector<2x32xf32>
    %364 = arith.negf %363 : vector<2x32xf32>
    %365 = math.exp %364 : vector<2x32xf32>
    %cst_68 = arith.constant 1.000000e+00 : f32
    %366 = vector.broadcast %cst_68 : f32 to vector<2x32xf32>
    %367 = arith.addf %366, %365 : vector<2x32xf32>
    %368 = arith.divf %366, %367 : vector<2x32xf32>
    %369 = vector.extract_strided_slice %356 {offsets = [0, 64], sizes = [2, 32], strides = [1, 1]} : vector<2x128xf32> to vector<2x32xf32>
    %370 = math.tanh %369 : vector<2x32xf32>
    %371 = vector.extract_strided_slice %356 {offsets = [0, 96], sizes = [2, 32], strides = [1, 1]} : vector<2x128xf32> to vector<2x32xf32>
    %372 = arith.negf %371 : vector<2x32xf32>
    %373 = math.exp %372 : vector<2x32xf32>
    %cst_69 = arith.constant 1.000000e+00 : f32
    %374 = vector.broadcast %cst_69 : f32 to vector<2x32xf32>
    %375 = arith.addf %374, %373 : vector<2x32xf32>
    %376 = arith.divf %374, %375 : vector<2x32xf32>
    %377 = arith.mulf %368, %351 : vector<2x32xf32>
    %378 = arith.mulf %362, %370 : vector<2x32xf32>
    %379 = arith.addf %377, %378 : vector<2x32xf32>
    %380 = math.tanh %379 : vector<2x32xf32>
    %381 = arith.mulf %376, %380 : vector<2x32xf32>
    %382 = vector.extract_strided_slice %238 {offsets = [10, 0], sizes = [2, 128], strides = [1, 1]} : vector<16x128xf32> to vector<2x128xf32>
    %cst_70 = arith.constant dense<0.000000e+00> : vector<2x128xf32>
    %383 = tpu.matmul %381, %239, %cst_70 {dimension_numbers = #tpu.dot_dimension_numbers<[1], [0], [0], [1], [0, 0, 1, 1], [], []>} : vector<2x32xf32>, vector<32x128xf32>, vector<2x128xf32> -> vector<2x128xf32>
    %384 = arith.addf %382, %383 : vector<2x128xf32>
    %385 = vector.extract_strided_slice %384 {offsets = [0, 0], sizes = [2, 32], strides = [1, 1]} : vector<2x128xf32> to vector<2x32xf32>
    %386 = arith.negf %385 : vector<2x32xf32>
    %387 = math.exp %386 : vector<2x32xf32>
    %cst_71 = arith.constant 1.000000e+00 : f32
    %388 = vector.broadcast %cst_71 : f32 to vector<2x32xf32>
    %389 = arith.addf %388, %387 : vector<2x32xf32>
    %390 = arith.divf %388, %389 : vector<2x32xf32>
    %391 = vector.extract_strided_slice %384 {offsets = [0, 32], sizes = [2, 32], strides = [1, 1]} : vector<2x128xf32> to vector<2x32xf32>
    %392 = arith.negf %391 : vector<2x32xf32>
    %393 = math.exp %392 : vector<2x32xf32>
    %cst_72 = arith.constant 1.000000e+00 : f32
    %394 = vector.broadcast %cst_72 : f32 to vector<2x32xf32>
    %395 = arith.addf %394, %393 : vector<2x32xf32>
    %396 = arith.divf %394, %395 : vector<2x32xf32>
    %397 = vector.extract_strided_slice %384 {offsets = [0, 64], sizes = [2, 32], strides = [1, 1]} : vector<2x128xf32> to vector<2x32xf32>
    %398 = math.tanh %397 : vector<2x32xf32>
    %399 = vector.extract_strided_slice %384 {offsets = [0, 96], sizes = [2, 32], strides = [1, 1]} : vector<2x128xf32> to vector<2x32xf32>
    %400 = arith.negf %399 : vector<2x32xf32>
    %401 = math.exp %400 : vector<2x32xf32>
    %cst_73 = arith.constant 1.000000e+00 : f32
    %402 = vector.broadcast %cst_73 : f32 to vector<2x32xf32>
    %403 = arith.addf %402, %401 : vector<2x32xf32>
    %404 = arith.divf %402, %403 : vector<2x32xf32>
    %405 = arith.mulf %396, %379 : vector<2x32xf32>
    %406 = arith.mulf %390, %398 : vector<2x32xf32>
    %407 = arith.addf %405, %406 : vector<2x32xf32>
    %408 = math.tanh %407 : vector<2x32xf32>
    %409 = arith.mulf %404, %408 : vector<2x32xf32>
    %410 = vector.extract_strided_slice %238 {offsets = [12, 0], sizes = [2, 128], strides = [1, 1]} : vector<16x128xf32> to vector<2x128xf32>
    %cst_74 = arith.constant dense<0.000000e+00> : vector<2x128xf32>
    %411 = tpu.matmul %409, %239, %cst_74 {dimension_numbers = #tpu.dot_dimension_numbers<[1], [0], [0], [1], [0, 0, 1, 1], [], []>} : vector<2x32xf32>, vector<32x128xf32>, vector<2x128xf32> -> vector<2x128xf32>
    %412 = arith.addf %410, %411 : vector<2x128xf32>
    %413 = vector.extract_strided_slice %412 {offsets = [0, 0], sizes = [2, 32], strides = [1, 1]} : vector<2x128xf32> to vector<2x32xf32>
    %414 = arith.negf %413 : vector<2x32xf32>
    %415 = math.exp %414 : vector<2x32xf32>
    %cst_75 = arith.constant 1.000000e+00 : f32
    %416 = vector.broadcast %cst_75 : f32 to vector<2x32xf32>
    %417 = arith.addf %416, %415 : vector<2x32xf32>
    %418 = arith.divf %416, %417 : vector<2x32xf32>
    %419 = vector.extract_strided_slice %412 {offsets = [0, 32], sizes = [2, 32], strides = [1, 1]} : vector<2x128xf32> to vector<2x32xf32>
    %420 = arith.negf %419 : vector<2x32xf32>
    %421 = math.exp %420 : vector<2x32xf32>
    %cst_76 = arith.constant 1.000000e+00 : f32
    %422 = vector.broadcast %cst_76 : f32 to vector<2x32xf32>
    %423 = arith.addf %422, %421 : vector<2x32xf32>
    %424 = arith.divf %422, %423 : vector<2x32xf32>
    %425 = vector.extract_strided_slice %412 {offsets = [0, 64], sizes = [2, 32], strides = [1, 1]} : vector<2x128xf32> to vector<2x32xf32>
    %426 = math.tanh %425 : vector<2x32xf32>
    %427 = vector.extract_strided_slice %412 {offsets = [0, 96], sizes = [2, 32], strides = [1, 1]} : vector<2x128xf32> to vector<2x32xf32>
    %428 = arith.negf %427 : vector<2x32xf32>
    %429 = math.exp %428 : vector<2x32xf32>
    %cst_77 = arith.constant 1.000000e+00 : f32
    %430 = vector.broadcast %cst_77 : f32 to vector<2x32xf32>
    %431 = arith.addf %430, %429 : vector<2x32xf32>
    %432 = arith.divf %430, %431 : vector<2x32xf32>
    %433 = arith.mulf %424, %407 : vector<2x32xf32>
    %434 = arith.mulf %418, %426 : vector<2x32xf32>
    %435 = arith.addf %433, %434 : vector<2x32xf32>
    %436 = math.tanh %435 : vector<2x32xf32>
    %437 = arith.mulf %432, %436 : vector<2x32xf32>
    %438 = vector.extract_strided_slice %238 {offsets = [14, 0], sizes = [2, 128], strides = [1, 1]} : vector<16x128xf32> to vector<2x128xf32>
    %cst_78 = arith.constant dense<0.000000e+00> : vector<2x128xf32>
    %439 = tpu.matmul %437, %239, %cst_78 {dimension_numbers = #tpu.dot_dimension_numbers<[1], [0], [0], [1], [0, 0, 1, 1], [], []>} : vector<2x32xf32>, vector<32x128xf32>, vector<2x128xf32> -> vector<2x128xf32>
    %440 = arith.addf %438, %439 : vector<2x128xf32>
    %441 = vector.extract_strided_slice %440 {offsets = [0, 0], sizes = [2, 32], strides = [1, 1]} : vector<2x128xf32> to vector<2x32xf32>
    %442 = arith.negf %441 : vector<2x32xf32>
    %443 = math.exp %442 : vector<2x32xf32>
    %cst_79 = arith.constant 1.000000e+00 : f32
    %444 = vector.broadcast %cst_79 : f32 to vector<2x32xf32>
    %445 = arith.addf %444, %443 : vector<2x32xf32>
    %446 = arith.divf %444, %445 : vector<2x32xf32>
    %447 = vector.extract_strided_slice %440 {offsets = [0, 32], sizes = [2, 32], strides = [1, 1]} : vector<2x128xf32> to vector<2x32xf32>
    %448 = arith.negf %447 : vector<2x32xf32>
    %449 = math.exp %448 : vector<2x32xf32>
    %cst_80 = arith.constant 1.000000e+00 : f32
    %450 = vector.broadcast %cst_80 : f32 to vector<2x32xf32>
    %451 = arith.addf %450, %449 : vector<2x32xf32>
    %452 = arith.divf %450, %451 : vector<2x32xf32>
    %453 = vector.extract_strided_slice %440 {offsets = [0, 64], sizes = [2, 32], strides = [1, 1]} : vector<2x128xf32> to vector<2x32xf32>
    %454 = math.tanh %453 : vector<2x32xf32>
    %455 = vector.extract_strided_slice %440 {offsets = [0, 96], sizes = [2, 32], strides = [1, 1]} : vector<2x128xf32> to vector<2x32xf32>
    %456 = arith.negf %455 : vector<2x32xf32>
    %457 = math.exp %456 : vector<2x32xf32>
    %cst_81 = arith.constant 1.000000e+00 : f32
    %458 = vector.broadcast %cst_81 : f32 to vector<2x32xf32>
    %459 = arith.addf %458, %457 : vector<2x32xf32>
    %460 = arith.divf %458, %459 : vector<2x32xf32>
    %461 = arith.mulf %452, %435 : vector<2x32xf32>
    %462 = arith.mulf %446, %454 : vector<2x32xf32>
    %463 = arith.addf %461, %462 : vector<2x32xf32>
    %464 = math.tanh %463 : vector<2x32xf32>
    %465 = arith.mulf %460, %464 : vector<2x32xf32>
    %c0_82 = arith.constant 0 : index
    %c0_83 = arith.constant 0 : index
    %466 = vector.load %arg7[%c0_82, %c0_83] : memref<4x8xf32, #tpu.memory_space<vmem>>, vector<4x8xf32>
    %c0_84 = arith.constant 0 : index
    %c0_85 = arith.constant 0 : index
    %467 = vector.load %arg8[%c0_84, %c0_85] : memref<4x32xf32, #tpu.memory_space<vmem>>, vector<4x32xf32>
    %468 = vector.extract_strided_slice %269 {offsets = [0, 0], sizes = [1, 32], strides = [1, 1]} : vector<2x32xf32> to vector<1x32xf32>
    %469 = vector.extract_strided_slice %297 {offsets = [0, 0], sizes = [1, 32], strides = [1, 1]} : vector<2x32xf32> to vector<1x32xf32>
    %470 = vector.extract_strided_slice %325 {offsets = [0, 0], sizes = [1, 32], strides = [1, 1]} : vector<2x32xf32> to vector<1x32xf32>
    %471 = vector.extract_strided_slice %353 {offsets = [0, 0], sizes = [1, 32], strides = [1, 1]} : vector<2x32xf32> to vector<1x32xf32>
    %472 = vector.extract_strided_slice %381 {offsets = [0, 0], sizes = [1, 32], strides = [1, 1]} : vector<2x32xf32> to vector<1x32xf32>
    %473 = vector.extract_strided_slice %409 {offsets = [0, 0], sizes = [1, 32], strides = [1, 1]} : vector<2x32xf32> to vector<1x32xf32>
    %474 = vector.extract_strided_slice %437 {offsets = [0, 0], sizes = [1, 32], strides = [1, 1]} : vector<2x32xf32> to vector<1x32xf32>
    %475 = vector.extract_strided_slice %465 {offsets = [0, 0], sizes = [1, 32], strides = [1, 1]} : vector<2x32xf32> to vector<1x32xf32>
    %476 = tpu.concatenate %468, %469, %470, %471, %472, %473, %474, %475 in 0 : vector<1x32xf32>, vector<1x32xf32>, vector<1x32xf32>, vector<1x32xf32>, vector<1x32xf32>, vector<1x32xf32>, vector<1x32xf32>, vector<1x32xf32> -> vector<8x32xf32>
    %cst_86 = arith.constant dense<0.000000e+00> : vector<4x32xf32>
    %477 = tpu.matmul %466, %476, %cst_86 {dimension_numbers = #tpu.dot_dimension_numbers<[1], [0], [0], [1], [0, 0, 1, 1], [], []>} : vector<4x8xf32>, vector<8x32xf32>, vector<4x32xf32> -> vector<4x32xf32>
    %478 = arith.addf %477, %467 : vector<4x32xf32>
    %cst_87 = arith.constant 0.000000e+00 : f32
    %479 = vector.broadcast %cst_87 : f32 to vector<4x32xf32>
    %480 = arith.maximumf %478, %479 : vector<4x32xf32>
    %c0_88 = arith.constant 0 : index
    %c0_89 = arith.constant 0 : index
    %c0_90 = arith.constant 0 : index
    %481 = vector.load %arg9[%c0_88, %c0_89, %c0_90] : memref<2x4x32xf32, #tpu.memory_space<vmem>>, vector<1x4x32xf32>
    %482 = vector.shape_cast %481 : vector<1x4x32xf32> to vector<4x32xf32>
    %483 = vector.shape_cast %480 : vector<4x32xf32> to vector<1x4x32xf32>
    tpu.vector_store %arg9[%c0_88, %c0_89, %c0_90], %483 {strides = array<i32>} : memref<2x4x32xf32, #tpu.memory_space<vmem>>, vector<1x4x32xf32>,
    %484 = vector.extract_strided_slice %269 {offsets = [1, 0], sizes = [1, 32], strides = [1, 1]} : vector<2x32xf32> to vector<1x32xf32>
    %485 = vector.extract_strided_slice %297 {offsets = [1, 0], sizes = [1, 32], strides = [1, 1]} : vector<2x32xf32> to vector<1x32xf32>
    %486 = vector.extract_strided_slice %325 {offsets = [1, 0], sizes = [1, 32], strides = [1, 1]} : vector<2x32xf32> to vector<1x32xf32>
    %487 = vector.extract_strided_slice %353 {offsets = [1, 0], sizes = [1, 32], strides = [1, 1]} : vector<2x32xf32> to vector<1x32xf32>
    %488 = vector.extract_strided_slice %381 {offsets = [1, 0], sizes = [1, 32], strides = [1, 1]} : vector<2x32xf32> to vector<1x32xf32>
    %489 = vector.extract_strided_slice %409 {offsets = [1, 0], sizes = [1, 32], strides = [1, 1]} : vector<2x32xf32> to vector<1x32xf32>
    %490 = vector.extract_strided_slice %437 {offsets = [1, 0], sizes = [1, 32], strides = [1, 1]} : vector<2x32xf32> to vector<1x32xf32>
    %491 = vector.extract_strided_slice %465 {offsets = [1, 0], sizes = [1, 32], strides = [1, 1]} : vector<2x32xf32> to vector<1x32xf32>
    %492 = tpu.concatenate %484, %485, %486, %487, %488, %489, %490, %491 in 0 : vector<1x32xf32>, vector<1x32xf32>, vector<1x32xf32>, vector<1x32xf32>, vector<1x32xf32>, vector<1x32xf32>, vector<1x32xf32>, vector<1x32xf32> -> vector<8x32xf32>
    %cst_91 = arith.constant dense<0.000000e+00> : vector<4x32xf32>
    %493 = tpu.matmul %466, %492, %cst_91 {dimension_numbers = #tpu.dot_dimension_numbers<[1], [0], [0], [1], [0, 0, 1, 1], [], []>} : vector<4x8xf32>, vector<8x32xf32>, vector<4x32xf32> -> vector<4x32xf32>
    %494 = arith.addf %493, %467 : vector<4x32xf32>
    %cst_92 = arith.constant 0.000000e+00 : f32
    %495 = vector.broadcast %cst_92 : f32 to vector<4x32xf32>
    %496 = arith.maximumf %494, %495 : vector<4x32xf32>
    %c1 = arith.constant 1 : index
    %c0_93 = arith.constant 0 : index
    %c0_94 = arith.constant 0 : index
    %497 = vector.load %arg9[%c1, %c0_93, %c0_94] : memref<2x4x32xf32, #tpu.memory_space<vmem>>, vector<1x4x32xf32>
    %498 = vector.shape_cast %497 : vector<1x4x32xf32> to vector<4x32xf32>
    %499 = vector.shape_cast %496 : vector<4x32xf32> to vector<1x4x32xf32>
    tpu.vector_store %arg9[%c1, %c0_93, %c0_94], %499 {strides = array<i32>} : memref<2x4x32xf32, #tpu.memory_space<vmem>>, vector<1x4x32xf32>,
    return
  }
}

</mosaic_0001>

<bundles_post_ra>
// kernel: lstm_model_forward.1
= control target key start
LH: loop header
LB: loop body
LE: loop exit
PB: predicated region body
PF: predicated region fallthrough
CT: control target
= control target key end

     0   :  { %14 = vsyncpa [#allocation3], 0  ;;  %s3324_s0 = inlined_call_operand.hbm [shape: f32[16,16], index: 0, kind: input, shape index: {}]   ;;  %s3325_s1 = inlined_call_operand.hbm [shape: f32[16,128], index: 1, kind: input, shape index: {}]   ;;  %s3326_s2 = inlined_call_operand.vmem [shape: f32[32,128], index: 2, kind: input, shape index: {}]   ;;  %s3327_s3 = inlined_call_operand.vmem [shape: f32[1,128], index: 3, kind: input, shape index: {}]   ;;  %s3328_s4 = inlined_call_operand.vmem [shape: f32[32,128], index: 4, kind: input, shape index: {}]   ;;  %s3329_s5 = inlined_call_operand.hbm [shape: f32[32,128], index: 5, kind: input, shape index: {}]   ;;  %s3330_s6 = inlined_call_operand.vmem [shape: f32[1,128], index: 6, kind: input, shape index: {}]   ;;  %s3331_s7 = inlined_call_operand.hbm [shape: f32[4,8], index: 7, kind: input, shape index: {}]   ;;  %s3332_s8 = inlined_call_operand.vmem [shape: f32[4,32], index: 8, kind: input, shape index: {}]   ;;  %s3333_s9 = inlined_call_operand.hbm [shape: f32[2,4,32], index: 9, kind: output, shape index: {}]  }
   0x1   :  { %15 = vsyncpa [#allocation6], 0 }
   0x2   :  { %16 = vsyncpa [#allocation9], 0 }
   0x3   :  { %17 = vsyncpa [#allocation4], 0  ;;  %s2902_s30 = smov [#allocation5]   ;;  %s2903_s11 = smov [#allocation2]  }
   0x4   :  { %s35_s10 = sshll.u32 %s2902_s30, 4  ;;  %s23_s12 = sshll.u32 %s2903_s11, 4  ;;  %s36_s10 = int_to_ptr.vmem [resolvable:$true] %s35_s10  ;;  %s2965_s12 = int_to_ptr.vmem [resolvable:$true] %s23_s12 }
   0x5   :  { %s2784_s15 = scalar_lea.hbm %s3325_s1, 256 }
   0x6   :  { %p2785_p0 = scmp.ne.s32.totalorder %s3325_s1, %s2784_s15  ;;  %p2788_p1 = scmp.lt.u32.totalorder %s2784_s15, %s3325_s1 }
   0x8   :  { %p2790_p2 = pnand %p2788_p1, %p2785_p0 }
   0xa   :  { %2793 = shalt.err (!%p2790_p2)
}
   0xb   :  { %s2794_s20 = scalar_lea.vmem %s36_s10, 256  ;;  %p2799_p4 = scmp.lt.s32.totalorder %s36_s10, %s36_s10 }
   0xc   :  { %p2795_p3 = scmp.ne.s32.totalorder %s36_s10, %s2794_s20  ;;  %p2800_p5 = scmp.lt.s32.totalorder %s2794_s20, %s2794_s20 }
   0xe   :  { %p2801_p6 = por %p2800_p5, %p2799_p4 }
  0x10   :  { %p2802_p7 = pnand %p2801_p6, %p2795_p3 }
  0x12   :  { %2805 = shalt.err (!%p2802_p7)
}
  0x13   :  { %s2904_s21 = smov 128   ;;  %s2905_s22 = smov 8  }
  0x14   :  { %41 = dma.hbm_to_vmem [thread:$0]  %s3325_s1, 256, %s36_s10, [#allocation6], %s2904_s21, %s2904_s21, %s2905_s22  }
  0x15   :  { %s2806_s27 = scalar_lea.hbm %s3324_s0, 256 }
  0x16   :  { %p2807_p8 = scmp.ne.s32.totalorder %s3324_s0, %s2806_s27  ;;  %p2810_p9 = scmp.lt.u32.totalorder %s2806_s27, %s3324_s0 }
  0x18   :  { %p2812_p10 = pnand %p2810_p9, %p2807_p8 }
  0x1a   :  { %2815 = shalt.err (!%p2812_p10)
}
  0x1b   :  { %s2816_s13 = scalar_lea.vmem %s2965_s12, 256  ;;  %p2821_p12 = scmp.lt.s32.totalorder %s2965_s12, %s2965_s12 }
  0x1c   :  { %p2817_p11 = scmp.ne.s32.totalorder %s2965_s12, %s2816_s13  ;;  %p2822_p13 = scmp.lt.s32.totalorder %s2816_s13, %s2816_s13 }
  0x1e   :  { %p2823_p0 = por %p2822_p13, %p2821_p12 }
  0x20   :  { %p2824_p1 = pnand %p2823_p0, %p2817_p11 }
  0x22   :  { %2827 = shalt.err (!%p2824_p1)
}
  0x23   :  { %29 = dma.hbm_to_vmem [thread:$0]  %s3324_s0, 256, %s2965_s12, [#allocation3], %s2904_s21, %s2904_s21, %s2905_s22  }
  0x24   :  { %s2906_s14 = smov [#allocation7]   ;;  %s2907_s16 = smov [#allocation8]  }
  0x25   :  { %s53_s15 = sshll.u32 %s2906_s14, 4  ;;  %s68_s17 = sshll.u32 %s2907_s16, 4  ;;  %s54_s15 = int_to_ptr.vmem [resolvable:$true] %s53_s15  ;;  %s69_s17 = int_to_ptr.vmem [resolvable:$true] %s68_s17 }
  0x26   :  { %s2828_s20 = scalar_lea.hbm %s3329_s5, 512 }
  0x27   :  { %p2829_p2 = scmp.ne.s32.totalorder %s3329_s5, %s2828_s20  ;;  %p2832_p3 = scmp.lt.u32.totalorder %s2828_s20, %s3329_s5 }
  0x29   :  { %p2834_p4 = pnand %p2832_p3, %p2829_p2 }
  0x2b   :  { %2837 = shalt.err (!%p2834_p4)
}
  0x2c   :  { %s2838_s0 = scalar_lea.vmem %s54_s15, 512  ;;  %p2843_p6 = scmp.lt.s32.totalorder %s54_s15, %s54_s15 }
  0x2d   :  { %p2839_p5 = scmp.ne.s32.totalorder %s54_s15, %s2838_s0  ;;  %p2844_p7 = scmp.lt.s32.totalorder %s2838_s0, %s2838_s0 }
  0x2f   :  { %p2845_p8 = por %p2844_p7, %p2843_p6 }
  0x31   :  { %p2846_p9 = pnand %p2845_p8, %p2839_p5 }
  0x33   :  { %2849 = shalt.err (!%p2846_p9)
}
  0x34   :  { %59 = dma.hbm_to_vmem [thread:$0]  %s3329_s5, 512, %s54_s15, [#allocation6], %s2904_s21, %s2904_s21, %s2905_s22  }
  0x35   :  { %s2850_s30 = scalar_lea.hbm %s3331_s7, 64 }
  0x36   :  { %p2851_p10 = scmp.ne.s32.totalorder %s3331_s7, %s2850_s30  ;;  %p2854_p11 = scmp.lt.u32.totalorder %s2850_s30, %s3331_s7 }
  0x38   :  { %p2856_p12 = pnand %p2854_p11, %p2851_p10 }
  0x3a   :  { %2859 = shalt.err (!%p2856_p12)
}
  0x3b   :  { %s2860_s14 = scalar_lea.vmem %s69_s17, 64  ;;  %p2865_p0 = scmp.lt.s32.totalorder %s69_s17, %s69_s17 }
  0x3c   :  { %p2861_p13 = scmp.ne.s32.totalorder %s69_s17, %s2860_s14  ;;  %p2866_p1 = scmp.lt.s32.totalorder %s2860_s14, %s2860_s14 }
  0x3e   :  { %p2867_p2 = por %p2866_p1, %p2865_p0 }
  0x40   :  { %p2868_p3 = pnand %p2867_p2, %p2861_p13 }
  0x42   :  { %2871 = shalt.err (!%p2868_p3)
}
  0x43   :  { %71 = dma.hbm_to_vmem [thread:$0]  %s3331_s7, 64, %s69_s17, [#allocation9]  }
  0x44   :  { %2894 = dma.done.wait [#allocation3], 256  }
  0x45   :  { %2895 = vsyncadd [#allocation3], 4294967040 }
  0x46   :  { %2896 = dma.done.wait [#allocation6], 768  }
  0x47   :  { %2897 = vsyncadd [#allocation6], 4294966528 }
  0x48   :  { %2898 = dma.done.wait [#allocation9], 64  }
  0x49   :  { %2899 = vsyncadd [#allocation9], 4294967232  ;;  %v2908_v0 = vmov 0.0|0.0   ;;  %vm2909_vm0 = vmmov 0   ;;  %v2910_v1 = vmov 0.0   ;;  %vm97_vm1 = vcmask 130048  }
  0x4a   :  { %2539 = vmatprep.subr.bf16.mxu1 %v2908_v0  ;;  %2346 = vmatprep.mubr.msk.f32.mxu1 %vm2909_vm0, %v2910_v1  ;;  %v88_v2 = vld [vmem:[#allocation5] sm:$0xff]  ;;  %v89_v3 = vld [vmem:[#allocation5 + $0x8] sm:$0xff]  ;;  %v179_v4 = vld [vmem:[%s3326_s2] sm:$0xff]  ;;  %s2911_s24 = smov 64   ;;  %vm183_vm2 = vcmask 261120   ;;  %vm1026_vm3 = vcmask 1041408  }
  0x4b   :  { %v2535_v5 = vpack.c.bf16 %v89_v3, %v88_v2  ;;  %v180_v6 = vld [vmem:[%s3326_s2 + $0x8] sm:$0xff]  ;;  %v86_v7 = vld [vmem:[#allocation2] sm:$0xff]  ;;  %v181_v9 = vld [vmem:[%s3326_s2 + $0x10] sm:$0xff]  ;;  %vm1028_vm4 = vcmask 1043456   ;;  %vm1030_vm5 = vcmask 1045504   ;;  %vm1991_vm6 = vcmask 1040384  }
  0x4c   :  { %v3038_v8 = vpack.c.bf16 %v180_v6, %v179_v4  ;;  %2335 = vmatprep.mubr.msk.f32.mxu0 %vm97_vm1, %v86_v7  ;;  %v182_v10 = vld [vmem:[%s3326_s2 + $0x18] sm:$0xff]  ;;  %v87_v11 = vld [vmem:[#allocation2 + $0x8] sm:$0xff]  ;;  %v2199_v13 = vld [vmem:[%s3327_s3] ss:$0 sm:$0xff]  ;;  %s2912_s3 = smov 32   ;;  %vm1994_vm7 = vcmask 1042432  }
  0x4d   :  { %2536 = vmatprep.subr.bf16.mxu0 %v2535_v5  ;;  %v3048_v12 = vpack.c.bf16 %v182_v10, %v181_v9  ;;  %vm1997_vm8 = vcmask 1044480   ;;  %vm2000_vm9 = vcmask 1046528   ;;  %vm2006_vm10 = vcmask 64512   ;;  %s2913_s1 = smov [#allocation10]  }
  0x4e   :  { %2541 = vmatpush3.bf16.msra.mxu1 %v3038_v8  ;;  %2538 = vmatpush3.bf16.msra.mxu0 %v2535_v5  ;;  %vm2081_vm11 = vcmask 257024   ;;  %s2185_s10 = sshll.u32 %s2913_s1, 4  ;;  %s2186_s10 = int_to_ptr.vmem [resolvable:$true] %s2185_s10 }
  0x4f   :  { %2542 = vmatprep.subr.bf16.mxu1 %v2908_v0  ;;  %2545 = vmatprep.subr.bf16.mxu0 %v2908_v0  ;;  %s2872_s14 = scalar_lea.vmem %s2186_s10, 128  ;;  %p2877_p5 = scmp.lt.s32.totalorder %s2186_s10, %s2186_s10 }
  0x50   :  { %p2873_p4 = scmp.ne.s32.totalorder %s2186_s10, %s2872_s14  ;;  %p2878_p6 = scmp.lt.s32.totalorder %s2872_s14, %s2872_s14 }
  0x51   :  { %2336 = vmatmul.mubr.msk.f32.vlgmr.msra.gmra.mrb[0].mxu0 %vm97_vm1, %v87_v11 }
  0x52   :  { %2544 = vmatpush3.bf16.msra.mxu1 %v3048_v12  ;;  %2547 = vmatpush3.bf16.msra.mxu0 %v3038_v8  ;;  %p2879_p7 = por %p2878_p6, %p2877_p5 }
  0x53   :  { %2548 = vmatprep.subr.bf16.mxu0 %v2908_v0  ;;  %2357 = vmatprep.mubr.msk.f32.mxu0 %vm2909_vm0, %v2910_v1 }
  0x54   :  { %2551 = vmatprep.subr.bf16.mxu1 %v2908_v0  ;;  %p2880_p8 = pnand %p2879_p7, %p2873_p4 }
  0x55   :  { %2347 = vmatmul.mubr.f32.vlgmr.msra.gmra.mrb[0].mxu1 %v2910_v1 }
  0x56   :  { %2550 = vmatpush3.bf16.msra.mxu0 %v3048_v12  ;;  %2553 = vmatpush3.bf16.msra.mxu1 %v3038_v8 }
  0x57   :  { %2554 = vmatprep.subr.bf16.mxu1 %v2908_v0  ;;  %2368 = vmatprep.mubr.msk.f32.mxu1 %vm2909_vm0, %v2910_v1 }
  0x58   :  { %2557 = vmatprep.subr.bf16.mxu0 %v2908_v0 }
  0x5a   :  { %2556 = vmatpush3.bf16.msra.mxu1 %v3048_v12 }
  0x5b   :  { %2563 = vmatprep.subr.bf16.mxu1 %v2908_v0 }
 0x124   :  { %v2337_v14 = vpop.f32.mrb[0].mxu0 }
 0x125   :  { %v3071_v15 = vadd.f32 %v2337_v14, %v2199_v13  ;;  %v170_v16 = vpop.f32.mrb[1].mxu0 }
 0x126   :  { %v3073_v17 = vadd.f32 %v2199_v13, %v170_v16 }
 0x128   :  { %v253_v18 = vpop.f32.mrb[0].mxu1 }
 0x129   :  { %v257_v19 = vadd.f32 %v253_v18, %v3073_v17  ;;  %v2348_v20 = vpop.f32.mrb[1].mxu1 }
 0x12b   :  { %2656 = vtanh.f32 %v257_v19  ;;  %v2202_v22 = vmul.f32 -1.442695, %v257_v19 }
 0x12d   :  { %2658 = vpow2.f32 %v2202_v22 }
 0x135   :  { %v2657_v21 = vpop.eup %2656 }
 0x136   :  { %267 = vrot.lane.b32.xlu0 %v2657_v21, %s2911_s24 }
 0x137   :  { %v2659_v23 = vpop.eup %2658 }
 0x138   :  { %v261_v24 = vadd.f32 1.0, %v2659_v23 }
 0x13a   :  { %2660 = vrcp.f32 %v261_v24 }
 0x144   :  { %v2661_v25 = vpop.eup %2660 }
 0x145   :  { %v265_v28 = vmul.f32 0.0, %v2661_v25 }
 0x1a8   :  { %v268_v26 = vpop.permute.xlu0 %267 }
 0x1a9   :  { %v270_v27 = vmul.f32 %v2661_v25, %v268_v26 }
 0x1ab   :  { %272 = vrot.lane.b32.xlu0 %v270_v27, %s2912_s3 }
 0x21d   :  { %v273_v29 = vpop.permute.xlu0 %272 }
 0x21e   :  { %v275_v30 = vadd.f32 %v273_v29, %v265_v28 }
 0x220   :  { %2662 = vtanh.f32 %v275_v30  ;;  %v369_v46 = vrot.slane %v275_v30, 6 }
 0x22a   :  { %v2663_v31 = vpop.eup %2662 }
 0x22b   :  { %278 = vrot.lane.b32.xlu1 %v2663_v31, %s2911_s24 }
 0x29d   :  { %v279_v32 = vpop.permute.xlu1 %278 }
 0x29e   :  { %v3079_v33 = vmul.f32 %v2661_v25, %v279_v32 }
 0x2a0   :  { %283 = vrot.lane.b32.xlu1 %v3079_v33, %s2912_s3 }
 0x312   :  { %v284_v34 = vpop.permute.xlu1 %283 }
 0x313   :  { %2358 = vmatmul.mubr.msk.f32.vlgmr.msra.gmra.mrb[2].mxu0 %vm183_vm2, %v284_v34 }
 0x314   :  { %2559 = vmatpush3.bf16.msra.mxu0 %v3038_v8  ;;  %2379 = vmatprep.mubr.msk.f32.mxu0 %vm2909_vm0, %v2910_v1 }
 0x315   :  { %2560 = vmatprep.subr.bf16.mxu0 %v2908_v0 }
 0x318   :  { %2562 = vmatpush3.bf16.msra.mxu0 %v3048_v12 }
 0x319   :  { %2569 = vmatprep.subr.bf16.mxu0 %v2908_v0 }
 0x3e6   :  { %v353_v35 = vpop.f32.mrb[2].mxu0 }
 0x3e7   :  { %v358_v36 = vrot.slane %v353_v35, 6  ;;  %v2359_v37 = vpop.f32.mrb[3].mxu0 }
 0x3e9   :  { %v360_v38 = vadd.f32 %v358_v36, %v3073_v17 }
 0x3eb   :  { %2664 = vtanh.f32 %v360_v38  ;;  %v2204_v40 = vmul.f32 -1.442695, %v360_v38 }
 0x3ed   :  { %2666 = vpow2.f32 %v2204_v40 }
 0x3f5   :  { %v2665_v39 = vpop.eup %2664 }
 0x3f6   :  { %373 = vrot.lane.b32.xlu0 %v2665_v39, %s2911_s24 }
 0x3f7   :  { %v2667_v41 = vpop.eup %2666 }
 0x3f8   :  { %v364_v42 = vadd.f32 1.0, %v2667_v41 }
 0x3fa   :  { %2668 = vrcp.f32 %v364_v42 }
 0x404   :  { %v2669_v43 = vpop.eup %2668 }
 0x405   :  { %v371_v47 = vmul.f32 %v2669_v43, %v369_v46 }
 0x468   :  { %v374_v44 = vpop.permute.xlu0 %373 }
 0x469   :  { %v376_v45 = vmul.f32 %v2669_v43, %v374_v44 }
 0x46b   :  { %378 = vrot.lane.b32.xlu1 %v376_v45, %s2912_s3 }
 0x4dd   :  { %v379_v48 = vpop.permute.xlu1 %378 }
 0x4de   :  { %v381_v49 = vadd.f32 %v379_v48, %v371_v47 }
 0x4e0   :  { %2670 = vtanh.f32 %v381_v49  ;;  %v476_v4 = vrot.slane %v381_v49, 6 }
 0x4ea   :  { %v2671_v50 = vpop.eup %2670 }
 0x4eb   :  { %384 = vrot.lane.b32.xlu0 %v2671_v50, %s2911_s24 }
 0x55d   :  { %v385_v51 = vpop.permute.xlu0 %384 }
 0x55e   :  { %v387_v52 = vmul.f32 %v2669_v43, %v385_v51 }
 0x560   :  { %v389_v53 = vrot.slane %v387_v52, 2  ;;  %v1027_v13 = vsel %vm1026_vm3, %v3079_v33, %v387_v52 }
 0x562   :  { %390 = vrot.lane.b32.xlu1 %v389_v53, %s2912_s3 }
 0x5d4   :  { %v391_v54 = vpop.permute.xlu1 %390 }
 0x5d5   :  { %2369 = vmatmul.mubr.msk.f32.vlgmr.msra.gmra.mrb[2].mxu1 %vm183_vm2, %v391_v54 }
 0x5d6   :  { %2565 = vmatpush3.bf16.msra.mxu1 %v3038_v8  ;;  %2390 = vmatprep.mubr.msk.f32.mxu1 %vm2909_vm0, %v2910_v1 }
 0x5d7   :  { %2566 = vmatprep.subr.bf16.mxu1 %v2908_v0 }
 0x5da   :  { %2568 = vmatpush3.bf16.msra.mxu1 %v3048_v12 }
 0x5db   :  { %2575 = vmatprep.subr.bf16.mxu1 %v2908_v0 }
 0x6a8   :  { %v460_v55 = vpop.f32.mrb[2].mxu1 }
 0x6a9   :  { %v465_v56 = vrot.slane %v460_v55, 4  ;;  %v2370_v57 = vpop.f32.mrb[3].mxu1 }
 0x6ab   :  { %v467_v58 = vadd.f32 %v465_v56, %v3073_v17 }
 0x6ad   :  { %2672 = vtanh.f32 %v467_v58  ;;  %v2206_v60 = vmul.f32 -1.442695, %v467_v58 }
 0x6af   :  { %2674 = vpow2.f32 %v2206_v60 }
 0x6b7   :  { %v2673_v59 = vpop.eup %2672 }
 0x6b8   :  { %480 = vrot.lane.b32.xlu0 %v2673_v59, %s2911_s24 }
 0x6b9   :  { %v2675_v61 = vpop.eup %2674 }
 0x6ba   :  { %v471_v62 = vadd.f32 1.0, %v2675_v61 }
 0x6bc   :  { %2676 = vrcp.f32 %v471_v62 }
 0x6c6   :  { %v2677_v63 = vpop.eup %2676 }
 0x6c7   :  { %v478_v5 = vmul.f32 %v2677_v63, %v476_v4 }
 0x72a   :  { %v481_v2 = vpop.permute.xlu0 %480 }
 0x72b   :  { %v483_v3 = vmul.f32 %v2677_v63, %v481_v2 }
 0x72d   :  { %485 = vrot.lane.b32.xlu1 %v483_v3, %s2912_s3 }
 0x79f   :  { %v486_v6 = vpop.permute.xlu1 %485 }
 0x7a0   :  { %v488_v7 = vadd.f32 %v486_v6, %v478_v5 }
 0x7a2   :  { %2678 = vtanh.f32 %v488_v7  ;;  %v583_v30 = vrot.slane %v488_v7, 6 }
 0x7ac   :  { %v2679_v9 = vpop.eup %2678 }
 0x7ad   :  { %491 = vrot.lane.b32.xlu0 %v2679_v9, %s2911_s24 }
 0x81f   :  { %v492_v10 = vpop.permute.xlu0 %491 }
 0x820   :  { %v494_v11 = vmul.f32 %v2677_v63, %v492_v10 }
 0x822   :  { %v496_v14 = vrot.slane %v494_v11, 4  ;;  %v1029_v16 = vsel %vm1028_vm4, %v1027_v13, %v494_v11 }
 0x824   :  { %497 = vrot.lane.b32.xlu1 %v496_v14, %s2912_s3 }
 0x896   :  { %v498_v18 = vpop.permute.xlu1 %497 }
 0x897   :  { %2380 = vmatmul.mubr.msk.f32.vlgmr.msra.gmra.mrb[4].mxu0 %vm183_vm2, %v498_v18 }
 0x898   :  { %2571 = vmatpush3.bf16.msra.mxu0 %v3038_v8  ;;  %2401 = vmatprep.mubr.msk.f32.mxu0 %vm2909_vm0, %v2910_v1 }
 0x899   :  { %2572 = vmatprep.subr.bf16.mxu0 %v2908_v0 }
 0x89c   :  { %2574 = vmatpush3.bf16.msra.mxu0 %v3048_v12 }
 0x89d   :  { %2581 = vmatprep.subr.bf16.mxu0 %v2908_v0 }
 0x96a   :  { %v567_v19 = vpop.f32.mrb[4].mxu0 }
 0x96b   :  { %v572_v20 = vrot.slane %v567_v19, 2  ;;  %v2381_v21 = vpop.f32.mrb[5].mxu0 }
 0x96d   :  { %v574_v22 = vadd.f32 %v572_v20, %v3073_v17 }
 0x96f   :  { %2680 = vtanh.f32 %v574_v22  ;;  %v2208_v24 = vmul.f32 -1.442695, %v574_v22 }
 0x971   :  { %2682 = vpow2.f32 %v2208_v24 }
 0x979   :  { %v2681_v23 = vpop.eup %2680 }
 0x97a   :  { %587 = vrot.lane.b32.xlu0 %v2681_v23, %s2911_s24 }
 0x97b   :  { %v2683_v25 = vpop.eup %2682 }
 0x97c   :  { %v578_v26 = vadd.f32 1.0, %v2683_v25 }
 0x97e   :  { %2684 = vrcp.f32 %v578_v26 }
 0x988   :  { %v2685_v27 = vpop.eup %2684 }
 0x989   :  { %v585_v31 = vmul.f32 %v2685_v27, %v583_v30 }
 0x9ec   :  { %v588_v28 = vpop.permute.xlu0 %587 }
 0x9ed   :  { %v590_v29 = vmul.f32 %v2685_v27, %v588_v28 }
 0x9ef   :  { %592 = vrot.lane.b32.xlu1 %v590_v29, %s2912_s3 }
 0xa61   :  { %v593_v32 = vpop.permute.xlu1 %592 }
 0xa62   :  { %v595_v33 = vadd.f32 %v593_v32, %v585_v31 }
 0xa64   :  { %2686 = vtanh.f32 %v595_v33  ;;  %v687_v49 = vrot.slane %v595_v33, 6 }
 0xa6e   :  { %v2687_v17 = vpop.eup %2686 }
 0xa6f   :  { %598 = vrot.lane.b32.xlu0 %v2687_v17, %s2911_s24 }
 0xae1   :  { %v599_v34 = vpop.permute.xlu0 %598 }
 0xae2   :  { %v601_v35 = vmul.f32 %v2685_v27, %v599_v34 }
 0xae4   :  { %v603_v36 = vrot.slane %v601_v35, 6  ;;  %v3122_v37 = vsel %vm1030_vm5, %v1029_v16, %v601_v35 }
 0xae6   :  { %604 = vrot.lane.b32.xlu1 %v603_v36, %s2912_s3 }
 0xb58   :  { %v605_v38 = vpop.permute.xlu1 %604 }
 0xb59   :  { %2391 = vmatmul.mubr.msk.f32.vlgmr.msra.gmra.mrb[4].mxu1 %vm183_vm2, %v605_v38 }
 0xb5a   :  { %2577 = vmatpush3.bf16.msra.mxu1 %v3038_v8  ;;  %2412 = vmatprep.mubr.msk.f32.mxu1 %vm2909_vm0, %v2910_v1 }
 0xb5b   :  { %2578 = vmatprep.subr.bf16.mxu1 %v2908_v0 }
 0xb5e   :  { %2580 = vmatpush3.bf16.msra.mxu1 %v3048_v12 }
 0xc2c   :  { %v674_v39 = vpop.f32.mrb[4].mxu1 }
 0xc2d   :  { %v678_v40 = vadd.f32 %v674_v39, %v3071_v15  ;;  %v2392_v41 = vpop.f32.mrb[5].mxu1 }
 0xc2f   :  { %2688 = vtanh.f32 %v678_v40  ;;  %v2210_v43 = vmul.f32 -1.442695, %v678_v40 }
 0xc31   :  { %2690 = vpow2.f32 %v2210_v43 }
 0xc39   :  { %v2689_v42 = vpop.eup %2688 }
 0xc3a   :  { %691 = vrot.lane.b32.xlu0 %v2689_v42, %s2911_s24 }
 0xc3b   :  { %v2691_v44 = vpop.eup %2690 }
 0xc3c   :  { %v682_v45 = vadd.f32 1.0, %v2691_v44 }
 0xc3e   :  { %2692 = vrcp.f32 %v682_v45 }
 0xc48   :  { %v2693_v46 = vpop.eup %2692 }
 0xc49   :  { %v689_v50 = vmul.f32 %v2693_v46, %v687_v49 }
 0xcac   :  { %v692_v47 = vpop.permute.xlu0 %691 }
 0xcad   :  { %v694_v48 = vmul.f32 %v2693_v46, %v692_v47 }
 0xcaf   :  { %696 = vrot.lane.b32.xlu1 %v694_v48, %s2912_s3 }
 0xd21   :  { %v697_v51 = vpop.permute.xlu1 %696 }
 0xd22   :  { %v699_v52 = vadd.f32 %v697_v51, %v689_v50 }
 0xd24   :  { %2694 = vtanh.f32 %v699_v52 }
 0xd2e   :  { %v2695_v53 = vpop.eup %2694 }
 0xd2f   :  { %702 = vrot.lane.b32.xlu0 %v2695_v53, %s2911_s24 }
 0xda1   :  { %v703_v54 = vpop.permute.xlu0 %702 }
 0xda2   :  { %v3135_v55 = vmul.f32 %v2693_v46, %v703_v54  ;;  %v1035_v54 = vld [vmem:[%s3328_s4] sm:$0xff] }
 0xda4   :  { %707 = vrot.lane.b32.xlu1 %v3135_v55, %s2912_s3 }
 0xe16   :  { %v708_v56 = vpop.permute.xlu1 %707 }
 0xe17   :  { %2402 = vmatmul.mubr.msk.f32.vlgmr.msra.gmra.mrb[6].mxu0 %vm183_vm2, %v708_v56  ;;  %v1131_v56 = vld [vmem:[#allocation7] sm:$0xff] }
 0xe18   :  { %2583 = vmatpush3.bf16.msra.mxu0 %v3038_v8  ;;  %2423 = vmatprep.mubr.msk.f32.mxu0 %vm2909_vm0, %v2910_v1 }
 0xe19   :  { %2584 = vmatprep.subr.bf16.mxu0 %v2908_v0 }
 0xe1c   :  { %2586 = vmatpush3.bf16.msra.mxu0 %v3048_v12  ;;  %v793_v12 = vrot.slane %v699_v52, 6 }
 0xe1d   :  { %2595 = vmatprep.subr.bf16.mxu0 %v2908_v0 }
 0xeea   :  { %v777_v57 = vpop.f32.mrb[6].mxu0 }
 0xeeb   :  { %v782_v58 = vrot.slane %v777_v57, 6  ;;  %v2403_v59 = vpop.f32.mrb[7].mxu0 }
 0xeec   :  { %v1038_v59 = vld [vmem:[%s3328_s4 + $0x18] sm:$0xff] }
 0xeed   :  { %v784_v60 = vadd.f32 %v782_v58, %v3071_v15  ;;  %v1132_v58 = vld [vmem:[#allocation7 + $0x8] sm:$0xff] }
 0xeef   :  { %2696 = vtanh.f32 %v784_v60  ;;  %v2212_v62 = vmul.f32 -1.442695, %v784_v60  ;;  %v3181_v60 = vpack.c.bf16 %v1132_v58, %v1131_v56 }
 0xef1   :  { %2698 = vpow2.f32 %v2212_v62  ;;  %v1133_v62 = vld [vmem:[#allocation7 + $0x10] sm:$0xff] }
 0xef9   :  { %v2697_v61 = vpop.eup %2696 }
 0xefa   :  { %797 = vrot.lane.b32.xlu0 %v2697_v61, %s2911_s24 }
 0xefb   :  { %v2699_v8 = vpop.eup %2698 }
 0xefc   :  { %v788_v63 = vadd.f32 1.0, %v2699_v8  ;;  %v1134_v8 = vld [vmem:[#allocation7 + $0x18] sm:$0xff] }
 0xefe   :  { %2700 = vrcp.f32 %v788_v63  ;;  %v3184_v63 = vpack.c.bf16 %v1134_v8, %v1133_v62 }
 0xf08   :  { %v2701_v2 = vpop.eup %2700 }
 0xf09   :  { %v795_v5 = vmul.f32 %v2701_v2, %v793_v12 }
 0xf6c   :  { %v798_v3 = vpop.permute.xlu0 %797 }
 0xf6d   :  { %v800_v4 = vmul.f32 %v2701_v2, %v798_v3 }
 0xf6f   :  { %802 = vrot.lane.b32.xlu1 %v800_v4, %s2912_s3 }
 0xfe1   :  { %v803_v6 = vpop.permute.xlu1 %802 }
 0xfe2   :  { %v805_v7 = vadd.f32 %v803_v6, %v795_v5 }
 0xfe4   :  { %2702 = vtanh.f32 %v805_v7  ;;  %v900_v28 = vrot.slane %v805_v7, 6 }
 0xfee   :  { %v2703_v9 = vpop.eup %2702 }
 0xfef   :  { %808 = vrot.lane.b32.xlu0 %v2703_v9, %s2911_s24  ;;  %v2217_v9 = vld [vmem:[%s3330_s6] ss:$0 sm:$0xff] }
0x1061   :  { %v809_v10 = vpop.permute.xlu0 %808 }
0x1062   :  { %v811_v11 = vmul.f32 %v2701_v2, %v809_v10 }
0x1064   :  { %v813_v13 = vrot.slane %v811_v11, 2  ;;  %v1032_v34 = vsel %vm1026_vm3, %v3135_v55, %v811_v11  ;;  %v1036_v55 = vld [vmem:[%s3328_s4 + $0x8] sm:$0xff] }
0x1065   :  { %v2587_v57 = vpack.c.bf16 %v1036_v55, %v1035_v54 }
0x1066   :  { %814 = vrot.lane.b32.xlu1 %v813_v13, %s2912_s3 }
0x1067   :  { %2588 = vmatprep.subr.bf16.mxu1 %v2587_v57 }
0x10d8   :  { %v815_v14 = vpop.permute.xlu1 %814 }
0x10d9   :  { %2413 = vmatmul.mubr.msk.f32.vlgmr.msra.gmra.mrb[6].mxu1 %vm183_vm2, %v815_v14 }
0x10da   :  { %2590 = vmatpush3.bf16.msra.mxu1 %v2587_v57 }
0x11ac   :  { %v884_v16 = vpop.f32.mrb[6].mxu1 }
0x11ad   :  { %v889_v18 = vrot.slane %v884_v16, 4  ;;  %v2414_v19 = vpop.f32.mrb[7].mxu1 }
0x11af   :  { %v891_v20 = vadd.f32 %v889_v18, %v3071_v15 }
0x11b1   :  { %2704 = vtanh.f32 %v891_v20  ;;  %v2214_v22 = vmul.f32 -1.442695, %v891_v20 }
0x11b3   :  { %2706 = vpow2.f32 %v2214_v22 }
0x11bb   :  { %v2705_v21 = vpop.eup %2704 }
0x11bc   :  { %904 = vrot.lane.b32.xlu0 %v2705_v21, %s2911_s24 }
0x11bd   :  { %v2707_v23 = vpop.eup %2706 }
0x11be   :  { %v895_v24 = vadd.f32 1.0, %v2707_v23 }
0x11c0   :  { %2708 = vrcp.f32 %v895_v24 }
0x11ca   :  { %v2709_v25 = vpop.eup %2708 }
0x11cb   :  { %v902_v29 = vmul.f32 %v2709_v25, %v900_v28 }
0x122e   :  { %v905_v26 = vpop.permute.xlu0 %904 }
0x122f   :  { %v907_v27 = vmul.f32 %v2709_v25, %v905_v26 }
0x1231   :  { %909 = vrot.lane.b32.xlu1 %v907_v27, %s2912_s3 }
0x12a3   :  { %v910_v30 = vpop.permute.xlu1 %909 }
0x12a4   :  { %v912_v31 = vadd.f32 %v910_v30, %v902_v29 }
0x12a6   :  { %2710 = vtanh.f32 %v912_v31  ;;  %v1007_v50 = vrot.slane %v912_v31, 6 }
0x12b0   :  { %v2711_v32 = vpop.eup %2710 }
0x12b1   :  { %915 = vrot.lane.b32.xlu0 %v2711_v32, %s2911_s24 }
0x1323   :  { %v916_v33 = vpop.permute.xlu0 %915 }
0x1324   :  { %v918_v17 = vmul.f32 %v2709_v25, %v916_v33 }
0x1326   :  { %v920_v35 = vrot.slane %v918_v17, 4  ;;  %v1033_v36 = vsel %vm1028_vm4, %v1032_v34, %v918_v17 }
0x1328   :  { %921 = vrot.lane.b32.xlu1 %v920_v35, %s2912_s3 }
0x139a   :  { %v922_v38 = vpop.permute.xlu1 %921 }
0x139b   :  { %2424 = vmatmul.mubr.msk.f32.vlgmr.msra.gmra.mrb[8].mxu0 %vm183_vm2, %v922_v38 }
0x139c   :  { %2445 = vmatprep.mubr.msk.f32.mxu0 %vm2909_vm0, %v2910_v1  ;;  %2597 = vmatpush3.bf16.msra.mxu0 %v3181_v60 }
0x139d   :  { %2598 = vmatprep.subr.bf16.mxu0 %v2908_v0 }
0x13a0   :  { %2600 = vmatpush3.bf16.msra.mxu0 %v3184_v63 }
0x13a1   :  { %2607 = vmatprep.subr.bf16.mxu0 %v2908_v0 }
0x13a3   :  { %2446 = vmatmul.mubr.f32.vlgmr.msra.gmra.mrb[10].mxu0 %v2910_v1 }
0x13a4   :  { %2609 = vmatpush3.bf16.msra.mxu0 %v3181_v60  ;;  %2467 = vmatprep.mubr.msk.f32.mxu0 %vm2909_vm0, %v2910_v1 }
0x13a5   :  { %2610 = vmatprep.subr.bf16.mxu0 %v2908_v0 }
0x13a8   :  { %2612 = vmatpush3.bf16.msra.mxu0 %v3184_v63 }
0x13a9   :  { %2619 = vmatprep.subr.bf16.mxu0 %v2908_v0 }
0x146e   :  { %v991_v39 = vpop.f32.mrb[8].mxu0 }
0x146f   :  { %v996_v40 = vrot.slane %v991_v39, 2  ;;  %v2425_v41 = vpop.f32.mrb[9].mxu0 }
0x1471   :  { %v998_v42 = vadd.f32 %v996_v40, %v3071_v15 }
0x1473   :  { %2712 = vtanh.f32 %v998_v42  ;;  %v2216_v44 = vmul.f32 -1.442695, %v998_v42 }
0x1475   :  { %2714 = vpow2.f32 %v2216_v44 }
0x1476   :  { %v1201_v6 = vpop.f32.mrb[10].mxu0 }
0x1477   :  { %v2447_v7 = vpop.f32.mrb[11].mxu0 }
0x147d   :  { %v2713_v43 = vpop.eup %2712 }
0x147e   :  { %1011 = vrot.lane.b32.xlu0 %v2713_v43, %s2911_s24 }
0x147f   :  { %v2715_v45 = vpop.eup %2714 }
0x1480   :  { %v1002_v46 = vadd.f32 1.0, %v2715_v45 }
0x1482   :  { %2716 = vrcp.f32 %v1002_v46 }
0x148c   :  { %v2717_v47 = vpop.eup %2716 }
0x148d   :  { %v1009_v51 = vmul.f32 %v2717_v47, %v1007_v50 }
0x14f0   :  { %v1012_v48 = vpop.permute.xlu0 %1011 }
0x14f1   :  { %v1014_v49 = vmul.f32 %v2717_v47, %v1012_v48 }
0x14f3   :  { %1016 = vrot.lane.b32.xlu1 %v1014_v49, %s2912_s3 }
0x14f7   :  { %1048 = vrot.lane.b32.xlu1 %v3122_v37, %s2912_s3  ;;  %v1037_v37 = vld [vmem:[%s3328_s4 + $0x10] sm:$0xff] }
0x14f8   :  { %v2591_v61 = vpack.c.bf16 %v1038_v59, %v1037_v37 }
0x14fa   :  { %2592 = vmatprep.subr.bf16.mxu1 %v2591_v61 }
0x14fb   :  { %2594 = vmatpush3.bf16.msra.mxu1 %v2591_v61 }
0x14fc   :  { %2601 = vmatprep.subr.bf16.mxu1 %v2908_v0 }
0x1565   :  { %v1017_v15 = vpop.permute.xlu1 %1016 }
0x1566   :  { %v1019_v52 = vadd.f32 %v1017_v15, %v1009_v51 }
0x1568   :  { %2718 = vtanh.f32 %v1019_v52 }
0x1569   :  { %v1049_v53 = vpop.permute.xlu1 %1048 }
0x156a   :  { %2434 = vmatprep.mubr.msk.f32.mxu1 %vm183_vm2, %v1049_v53 }
0x1572   :  { %v2719_v2 = vpop.eup %2718 }
0x1573   :  { %1022 = vrot.lane.b32.xlu0 %v2719_v2, %s2911_s24 }
0x15e5   :  { %v1023_v3 = vpop.permute.xlu0 %1022 }
0x15e6   :  { %v1025_v4 = vmul.f32 %v2717_v47, %v1023_v3 }
0x15e8   :  { %v1034_v12 = vsel %vm1030_vm5, %v1033_v36, %v1025_v4 }
0x15e9   :  { %1050 = vrot.lane.b32.xlu0 %v1034_v12, %s2912_s3 }
0x165b   :  { %v1051_v5 = vpop.permute.xlu0 %1050 }
0x165c   :  { %2435 = vmatmul.mubr.msk.f32.vlgmr.msra.gmra.mrb[8].mxu1 %vm183_vm2, %v1051_v5 }
0x165d   :  { %2603 = vmatpush3.bf16.msra.mxu1 %v3181_v60  ;;  %2456 = vmatprep.mubr.msk.f32.mxu1 %vm2909_vm0, %v2910_v1 }
0x165e   :  { %2604 = vmatprep.subr.bf16.mxu1 %v2908_v0 }
0x1661   :  { %2606 = vmatpush3.bf16.msra.mxu1 %v3184_v63 }
0x1662   :  { %2613 = vmatprep.subr.bf16.mxu1 %v2908_v0 }
0x172f   :  { %v2436_v10 = vpop.f32.mrb[8].mxu1 }
0x1730   :  { %v3210_v11 = vadd.f32 %v2436_v10, %v2217_v9  ;;  %v1122_v13 = vpop.f32.mrb[9].mxu1 }
0x1731   :  { %v3212_v14 = vadd.f32 %v2217_v9, %v1122_v13 }
0x1733   :  { %v1205_v16 = vadd.f32 %v1201_v6, %v3212_v14 }
0x1735   :  { %2720 = vtanh.f32 %v1205_v16  ;;  %v2220_v19 = vmul.f32 -1.442695, %v1205_v16 }
0x1737   :  { %2722 = vpow2.f32 %v2220_v19 }
0x173f   :  { %v2721_v18 = vpop.eup %2720 }
0x1740   :  { %1215 = vrot.lane.b32.xlu1 %v2721_v18, %s2911_s24 }
0x1741   :  { %v2723_v20 = vpop.eup %2722 }
0x1742   :  { %v1209_v21 = vadd.f32 1.0, %v2723_v20 }
0x1744   :  { %2724 = vrcp.f32 %v1209_v21 }
0x174e   :  { %v2725_v22 = vpop.eup %2724 }
0x174f   :  { %v1213_v25 = vmul.f32 0.0, %v2725_v22 }
0x17b2   :  { %v1216_v23 = vpop.permute.xlu1 %1215 }
0x17b3   :  { %v1218_v24 = vmul.f32 %v2725_v22, %v1216_v23 }
0x17b5   :  { %1220 = vrot.lane.b32.xlu0 %v1218_v24, %s2912_s3 }
0x1827   :  { %v1221_v26 = vpop.permute.xlu0 %1220 }
0x1828   :  { %v1223_v27 = vadd.f32 %v1221_v26, %v1213_v25 }
0x182a   :  { %2726 = vtanh.f32 %v1223_v27  ;;  %v1317_v43 = vrot.slane %v1223_v27, 6 }
0x1834   :  { %v2727_v28 = vpop.eup %2726 }
0x1835   :  { %1226 = vrot.lane.b32.xlu1 %v2727_v28, %s2911_s24 }
0x18a7   :  { %v1227_v29 = vpop.permute.xlu1 %1226 }
0x18a8   :  { %v3218_v30 = vmul.f32 %v2725_v22, %v1227_v29 }
0x18aa   :  { %1231 = vrot.lane.b32.xlu0 %v3218_v30, %s2912_s3  ;;  %v2083_v7 = vrot.slane %v3218_v30, 1 }
0x191c   :  { %v1232_v31 = vpop.permute.xlu0 %1231 }
0x191d   :  { %2457 = vmatmul.mubr.msk.f32.vlgmr.msra.gmra.mrb[10].mxu1 %vm183_vm2, %v1232_v31 }
0x191e   :  { %2615 = vmatpush3.bf16.msra.mxu1 %v3181_v60  ;;  %2478 = vmatprep.mubr.msk.f32.mxu1 %vm2909_vm0, %v2910_v1 }
0x191f   :  { %2616 = vmatprep.subr.bf16.mxu1 %v2908_v0 }
0x1922   :  { %2618 = vmatpush3.bf16.msra.mxu1 %v3184_v63 }
0x1923   :  { %2625 = vmatprep.subr.bf16.mxu1 %v2908_v0 }
0x19f0   :  { %v1301_v32 = vpop.f32.mrb[10].mxu1 }
0x19f1   :  { %v1306_v33 = vrot.slane %v1301_v32, 6  ;;  %v2458_v17 = vpop.f32.mrb[11].mxu1 }
0x19f3   :  { %v1308_v34 = vadd.f32 %v1306_v33, %v3212_v14 }
0x19f5   :  { %2728 = vtanh.f32 %v1308_v34  ;;  %v2222_v36 = vmul.f32 -1.442695, %v1308_v34 }
0x19f7   :  { %2730 = vpow2.f32 %v2222_v36 }
0x19ff   :  { %v2729_v35 = vpop.eup %2728 }
0x1a00   :  { %1321 = vrot.lane.b32.xlu1 %v2729_v35, %s2911_s24 }
0x1a01   :  { %v2731_v38 = vpop.eup %2730 }
0x1a02   :  { %v1312_v39 = vadd.f32 1.0, %v2731_v38 }
0x1a04   :  { %2732 = vrcp.f32 %v1312_v39 }
0x1a0e   :  { %v2733_v40 = vpop.eup %2732 }
0x1a0f   :  { %v1319_v44 = vmul.f32 %v2733_v40, %v1317_v43 }
0x1a72   :  { %v1322_v41 = vpop.permute.xlu1 %1321 }
0x1a73   :  { %v1324_v42 = vmul.f32 %v2733_v40, %v1322_v41 }
0x1a75   :  { %1326 = vrot.lane.b32.xlu0 %v1324_v42, %s2912_s3 }
0x1ae7   :  { %v1327_v45 = vpop.permute.xlu0 %1326 }
0x1ae8   :  { %v1329_v46 = vadd.f32 %v1327_v45, %v1319_v44 }
0x1aea   :  { %2734 = vtanh.f32 %v1329_v46  ;;  %v1424_v62 = vrot.slane %v1329_v46, 6 }
0x1af4   :  { %v2735_v47 = vpop.eup %2734 }
0x1af5   :  { %1332 = vrot.lane.b32.xlu1 %v2735_v47, %s2911_s24 }
0x1b67   :  { %v1333_v48 = vpop.permute.xlu1 %1332 }
0x1b68   :  { %v1335_v49 = vmul.f32 %v2733_v40, %v1333_v48 }
0x1b6a   :  { %v1337_v50 = vrot.slane %v1335_v49, 2  ;;  %v1976_v12 = vrot.slane %v1335_v49, 1 }
0x1b6c   :  { %1338 = vrot.lane.b32.xlu0 %v1337_v50, %s2912_s3  ;;  %v1992_v16 = vsel %vm1991_vm6, %v3218_v30, %v1976_v12  ;;  %v2096_v18 = vsel %vm1991_vm6, %v2083_v7, %v1337_v50 }
0x1bde   :  { %v1339_v51 = vpop.permute.xlu0 %1338 }
0x1bdf   :  { %2468 = vmatmul.mubr.msk.f32.vlgmr.msra.gmra.mrb[12].mxu0 %vm183_vm2, %v1339_v51 }
0x1be0   :  { %2621 = vmatpush3.bf16.msra.mxu0 %v3181_v60  ;;  %2489 = vmatprep.mubr.msk.f32.mxu0 %vm2909_vm0, %v2910_v1 }
0x1be1   :  { %2622 = vmatprep.subr.bf16.mxu0 %v2908_v0 }
0x1be4   :  { %2624 = vmatpush3.bf16.msra.mxu0 %v3184_v63 }
0x1be5   :  { %2631 = vmatprep.subr.bf16.mxu0 %v2908_v0 }
0x1cb2   :  { %v1408_v15 = vpop.f32.mrb[12].mxu0 }
0x1cb3   :  { %v1413_v52 = vrot.slane %v1408_v15, 4  ;;  %v2469_v53 = vpop.f32.mrb[13].mxu0 }
0x1cb5   :  { %v1415_v54 = vadd.f32 %v1413_v52, %v3212_v14 }
0x1cb7   :  { %2736 = vtanh.f32 %v1415_v54  ;;  %v2224_v56 = vmul.f32 -1.442695, %v1415_v54 }
0x1cb9   :  { %2738 = vpow2.f32 %v2224_v56 }
0x1cc1   :  { %v2737_v55 = vpop.eup %2736 }
0x1cc2   :  { %1428 = vrot.lane.b32.xlu1 %v2737_v55, %s2911_s24 }
0x1cc3   :  { %v2739_v57 = vpop.eup %2738 }
0x1cc4   :  { %v1419_v58 = vadd.f32 1.0, %v2739_v57 }
0x1cc6   :  { %2740 = vrcp.f32 %v1419_v58 }
0x1cd0   :  { %v2741_v37 = vpop.eup %2740 }
0x1cd1   :  { %v1426_v8 = vmul.f32 %v2741_v37, %v1424_v62 }
0x1d34   :  { %v1429_v59 = vpop.permute.xlu1 %1428 }
0x1d35   :  { %v1431_v61 = vmul.f32 %v2741_v37, %v1429_v59 }
0x1d37   :  { %1433 = vrot.lane.b32.xlu0 %v1431_v61, %s2912_s3 }
0x1da9   :  { %v1434_v2 = vpop.permute.xlu0 %1433 }
0x1daa   :  { %v1436_v3 = vadd.f32 %v1434_v2, %v1426_v8 }
0x1dac   :  { %2742 = vtanh.f32 %v1436_v3  ;;  %v1531_v33 = vrot.slane %v1436_v3, 6 }
0x1db6   :  { %v2743_v4 = vpop.eup %2742 }
0x1db7   :  { %1439 = vrot.lane.b32.xlu1 %v2743_v4, %s2911_s24 }
0x1e29   :  { %v1440_v5 = vpop.permute.xlu1 %1439 }
0x1e2a   :  { %v1442_v6 = vmul.f32 %v2741_v37, %v1440_v5 }
0x1e2c   :  { %v1978_v9 = vrot.slane %v1442_v6, 2  ;;  %v2086_v10 = vrot.slane %v1442_v6, 3  ;;  %v1444_v13 = vrot.slane %v1442_v6, 4 }
0x1e2e   :  { %v1993_v19 = vsel %vm1026_vm3, %v1992_v16, %v1978_v9  ;;  %v2097_v20 = vsel %vm1026_vm3, %v2096_v18, %v2086_v10  ;;  %1445 = vrot.lane.b32.xlu0 %v1444_v13, %s2912_s3 }
0x1ea0   :  { %v1446_v21 = vpop.permute.xlu0 %1445 }
0x1ea1   :  { %2479 = vmatmul.mubr.msk.f32.vlgmr.msra.gmra.mrb[12].mxu1 %vm183_vm2, %v1446_v21 }
0x1ea2   :  { %2627 = vmatpush3.bf16.msra.mxu1 %v3181_v60  ;;  %2500 = vmatprep.mubr.msk.f32.mxu1 %vm2909_vm0, %v2910_v1 }
0x1ea3   :  { %2628 = vmatprep.subr.bf16.mxu1 %v2908_v0 }
0x1ea6   :  { %2630 = vmatpush3.bf16.msra.mxu1 %v3184_v63 }
0x1ea7   :  { %2637 = vmatprep.subr.bf16.mxu1 %v2908_v0 }
0x1f74   :  { %v1515_v22 = vpop.f32.mrb[12].mxu1 }
0x1f75   :  { %v1520_v23 = vrot.slane %v1515_v22, 2  ;;  %v2480_v24 = vpop.f32.mrb[13].mxu1 }
0x1f77   :  { %v1522_v25 = vadd.f32 %v1520_v23, %v3212_v14 }
0x1f79   :  { %2744 = vtanh.f32 %v1522_v25  ;;  %v2226_v27 = vmul.f32 -1.442695, %v1522_v25 }
0x1f7b   :  { %2746 = vpow2.f32 %v2226_v27 }
0x1f83   :  { %v2745_v26 = vpop.eup %2744 }
0x1f84   :  { %1535 = vrot.lane.b32.xlu1 %v2745_v26, %s2911_s24 }
0x1f85   :  { %v2747_v28 = vpop.eup %2746 }
0x1f86   :  { %v1526_v29 = vadd.f32 1.0, %v2747_v28 }
0x1f88   :  { %2748 = vrcp.f32 %v1526_v29 }
0x1f92   :  { %v2749_v30 = vpop.eup %2748 }
0x1f93   :  { %v1533_v17 = vmul.f32 %v2749_v30, %v1531_v33 }
0x1ff6   :  { %v1536_v31 = vpop.permute.xlu1 %1535 }
0x1ff7   :  { %v1538_v32 = vmul.f32 %v2749_v30, %v1536_v31 }
0x1ff9   :  { %1540 = vrot.lane.b32.xlu0 %v1538_v32, %s2912_s3 }
0x206b   :  { %v1541_v34 = vpop.permute.xlu0 %1540 }
0x206c   :  { %v1543_v35 = vadd.f32 %v1541_v34, %v1533_v17 }
0x206e   :  { %2750 = vtanh.f32 %v1543_v35  ;;  %v1635_v54 = vrot.slane %v1543_v35, 6 }
0x2078   :  { %v2751_v14 = vpop.eup %2750 }
0x2079   :  { %1546 = vrot.lane.b32.xlu1 %v2751_v14, %s2911_s24 }
0x20eb   :  { %v1547_v36 = vpop.permute.xlu1 %1546 }
0x20ec   :  { %v1549_v38 = vmul.f32 %v2749_v30, %v1547_v36 }
0x20ee   :  { %v1980_v39 = vrot.slane %v1549_v38, 3  ;;  %v2088_v40 = vrot.slane %v1549_v38, 4  ;;  %v1551_v41 = vrot.slane %v1549_v38, 6 }
0x20f0   :  { %v1995_v42 = vsel %vm1994_vm7, %v1993_v19, %v1980_v39  ;;  %v2098_v43 = vsel %vm1994_vm7, %v2097_v20, %v2088_v40  ;;  %1552 = vrot.lane.b32.xlu0 %v1551_v41, %s2912_s3 }
0x2162   :  { %v1553_v44 = vpop.permute.xlu0 %1552 }
0x2163   :  { %2490 = vmatmul.mubr.msk.f32.vlgmr.msra.gmra.mrb[14].mxu0 %vm183_vm2, %v1553_v44 }
0x2164   :  { %2633 = vmatpush3.bf16.msra.mxu0 %v3181_v60  ;;  %2511 = vmatprep.mubr.msk.f32.mxu0 %vm2909_vm0, %v2910_v1 }
0x2165   :  { %2634 = vmatprep.subr.bf16.mxu0 %v2908_v0 }
0x2168   :  { %2636 = vmatpush3.bf16.msra.mxu0 %v3184_v63 }
0x2169   :  { %2525 = vmatprep.subr.mxu0 %v2910_v1 }
0x2236   :  { %v1622_v45 = vpop.f32.mrb[14].mxu0 }
0x2237   :  { %v1626_v46 = vadd.f32 %v1622_v45, %v3210_v11  ;;  %v2491_v47 = vpop.f32.mrb[15].mxu0 }
0x2239   :  { %2752 = vtanh.f32 %v1626_v46  ;;  %v2228_v49 = vmul.f32 -1.442695, %v1626_v46 }
0x223b   :  { %2754 = vpow2.f32 %v2228_v49 }
0x2243   :  { %v2753_v48 = vpop.eup %2752 }
0x2244   :  { %1639 = vrot.lane.b32.xlu1 %v2753_v48, %s2911_s24 }
0x2245   :  { %v2755_v50 = vpop.eup %2754 }
0x2246   :  { %v1630_v51 = vadd.f32 1.0, %v2755_v50 }
0x2248   :  { %2756 = vrcp.f32 %v1630_v51 }
0x2252   :  { %v2757_v15 = vpop.eup %2756 }
0x2253   :  { %v1637_v55 = vmul.f32 %v2757_v15, %v1635_v54 }
0x22b6   :  { %v1640_v52 = vpop.permute.xlu1 %1639 }
0x22b7   :  { %v1642_v53 = vmul.f32 %v2757_v15, %v1640_v52 }
0x22b9   :  { %1644 = vrot.lane.b32.xlu0 %v1642_v53, %s2912_s3 }
0x232b   :  { %v1645_v56 = vpop.permute.xlu0 %1644 }
0x232c   :  { %v1647_v57 = vadd.f32 %v1645_v56, %v1637_v55 }
0x232e   :  { %2758 = vtanh.f32 %v1647_v57 }
0x2338   :  { %v2759_v58 = vpop.eup %2758 }
0x2339   :  { %1650 = vrot.lane.b32.xlu1 %v2759_v58, %s2911_s24 }
0x23ab   :  { %v1651_v37 = vpop.permute.xlu1 %1650 }
0x23ac   :  { %v1653_v59 = vmul.f32 %v2757_v15, %v1651_v37 }
0x23ae   :  { %v1982_v61 = vrot.slane %v1653_v59, 4  ;;  %v2090_v62 = vrot.slane %v1653_v59, 5  ;;  %1655 = vrot.lane.b32.xlu0 %v1653_v59, %s2912_s3 }
0x23b0   :  { %v2099_v8 = vsel %vm1028_vm4, %v2098_v43, %v2090_v62  ;;  %v1996_v2 = vsel %vm1028_vm4, %v1995_v42, %v1982_v61 }
0x2420   :  { %v1656_v3 = vpop.permute.xlu0 %1655 }
0x2421   :  { %2501 = vmatmul.mubr.msk.f32.vlgmr.msra.gmra.mrb[14].mxu1 %vm183_vm2, %v1656_v3 }
0x2422   :  { %2639 = vmatpush3.bf16.msra.mxu1 %v3181_v60  ;;  %2522 = vmatprep.mubr.msk.f32.mxu1 %vm2909_vm0, %v2910_v1 }
0x2423   :  { %2640 = vmatprep.subr.bf16.mxu1 %v2908_v0  ;;  %v1741_v0 = vrot.slane %v1647_v57, 6 }
0x2426   :  { %2642 = vmatpush3.bf16.msra.mxu1 %v3184_v63 }
0x24f4   :  { %v1725_v4 = vpop.f32.mrb[14].mxu1 }
0x24f5   :  { %v1730_v12 = vrot.slane %v1725_v4, 6  ;;  %v2502_v5 = vpop.f32.mrb[15].mxu1 }
0x24f7   :  { %v1732_v6 = vadd.f32 %v1730_v12, %v3210_v11 }
0x24f9   :  { %2760 = vtanh.f32 %v1732_v6  ;;  %v2230_v9 = vmul.f32 -1.442695, %v1732_v6 }
0x24fb   :  { %2762 = vpow2.f32 %v2230_v9 }
0x2503   :  { %v2761_v7 = vpop.eup %2760 }
0x2504   :  { %1745 = vrot.lane.b32.xlu1 %v2761_v7, %s2911_s24 }
0x2505   :  { %v2763_v10 = vpop.eup %2762 }
0x2506   :  { %v1736_v60 = vadd.f32 1.0, %v2763_v10  ;;  %v1974_v10 = vld [vmem:[#allocation8] sm:$0xf] }
0x2508   :  { %2764 = vrcp.f32 %v1736_v60 }
0x2512   :  { %v2765_v13 = vpop.eup %2764 }
0x2513   :  { %v1743_v63 = vmul.f32 %v2765_v13, %v1741_v0 }
0x2576   :  { %v1746_v16 = vpop.permute.xlu1 %1745 }
0x2577   :  { %v1748_v18 = vmul.f32 %v2765_v13, %v1746_v16  ;;  %v1975_v16 = vld [vmem:[%s3332_s8] sm:$0xf] }
0x2579   :  { %1750 = vrot.lane.b32.xlu0 %v1748_v18, %s2912_s3 }
0x25eb   :  { %v1751_v19 = vpop.permute.xlu0 %1750 }
0x25ec   :  { %v1753_v20 = vadd.f32 %v1751_v19, %v1743_v63 }
0x25ee   :  { %2766 = vtanh.f32 %v1753_v20  ;;  %v1848_v40 = vrot.slane %v1753_v20, 6 }
0x25f8   :  { %v2767_v21 = vpop.eup %2766 }
0x25f9   :  { %1756 = vrot.lane.b32.xlu1 %v2767_v21, %s2911_s24 }
0x266b   :  { %v1757_v22 = vpop.permute.xlu1 %1756 }
0x266c   :  { %v1759_v23 = vmul.f32 %v2765_v13, %v1757_v22 }
0x266e   :  { %v1984_v24 = vrot.slane %v1759_v23, 5  ;;  %v2092_v25 = vrot.slane %v1759_v23, 6  ;;  %v1761_v26 = vrot.slane %v1759_v23, 2 }
0x2670   :  { %1762 = vrot.lane.b32.xlu0 %v1761_v26, %s2912_s3  ;;  %v2100_v27 = vsel %vm1997_vm8, %v2099_v8, %v2092_v25  ;;  %v1998_v28 = vsel %vm1997_vm8, %v1996_v2, %v1984_v24 }
0x26e2   :  { %v1763_v29 = vpop.permute.xlu0 %1762 }
0x26e3   :  { %2512 = vmatmul.mubr.msk.f32.vlgmr.msra.gmra.mrb[16].mxu0 %vm183_vm2, %v1763_v29 }
0x26e4   :  { %2527 = vmatprep.mubr.msk.f32.mxu0 %vm2909_vm0, %v2910_v1 }
0x27b6   :  { %v1832_v30 = vpop.f32.mrb[16].mxu0 }
0x27b7   :  { %v1837_v31 = vrot.slane %v1832_v30, 4  ;;  %v2513_v32 = vpop.f32.mrb[17].mxu0 }
0x27b9   :  { %v1839_v33 = vadd.f32 %v1837_v31, %v3210_v11 }
0x27bb   :  { %2768 = vtanh.f32 %v1839_v33  ;;  %v2232_v34 = vmul.f32 -1.442695, %v1839_v33 }
0x27bd   :  { %2770 = vpow2.f32 %v2232_v34 }
0x27c5   :  { %v2769_v17 = vpop.eup %2768 }
0x27c6   :  { %1852 = vrot.lane.b32.xlu1 %v2769_v17, %s2911_s24 }
0x27c7   :  { %v2771_v35 = vpop.eup %2770 }
0x27c8   :  { %v1843_v14 = vadd.f32 1.0, %v2771_v35 }
0x27ca   :  { %2772 = vrcp.f32 %v1843_v14 }
0x27d4   :  { %v2773_v36 = vpop.eup %2772 }
0x27d5   :  { %v1850_v41 = vmul.f32 %v2773_v36, %v1848_v40 }
0x2838   :  { %v1853_v38 = vpop.permute.xlu1 %1852 }
0x2839   :  { %v1855_v39 = vmul.f32 %v2773_v36, %v1853_v38 }
0x283b   :  { %1857 = vrot.lane.b32.xlu0 %v1855_v39, %s2912_s3 }
0x28ad   :  { %v1858_v42 = vpop.permute.xlu0 %1857 }
0x28ae   :  { %v1860_v43 = vadd.f32 %v1858_v42, %v1850_v41 }
0x28b0   :  { %2774 = vtanh.f32 %v1860_v43  ;;  %v1955_v8 = vrot.slane %v1860_v43, 6 }
0x28ba   :  { %v2775_v44 = vpop.eup %2774 }
0x28bb   :  { %1863 = vrot.lane.b32.xlu1 %v2775_v44, %s2911_s24 }
0x292d   :  { %v1864_v45 = vpop.permute.xlu1 %1863 }
0x292e   :  { %v1866_v46 = vmul.f32 %v2773_v36, %v1864_v45 }
0x2930   :  { %v1986_v47 = vrot.slane %v1866_v46, 6  ;;  %v2094_v48 = vrot.slane %v1866_v46, 7  ;;  %v1868_v49 = vrot.slane %v1866_v46, 4 }
0x2932   :  { %1869 = vrot.lane.b32.xlu0 %v1868_v49, %s2912_s3  ;;  %v2101_v50 = vsel %vm1030_vm5, %v2100_v27, %v2094_v48  ;;  %v1999_v51 = vsel %vm1030_vm5, %v1998_v28, %v1986_v47 }
0x29a4   :  { %v1870_v15 = vpop.permute.xlu0 %1869 }
0x29a5   :  { %2523 = vmatmul.mubr.msk.f32.vlgmr.msra.gmra.mrb[16].mxu1 %vm183_vm2, %v1870_v15 }
0x2a78   :  { %v1939_v52 = vpop.f32.mrb[16].mxu1 }
0x2a79   :  { %v1944_v53 = vrot.slane %v1939_v52, 2  ;;  %v2524_v54 = vpop.f32.mrb[17].mxu1 }
0x2a7b   :  { %v1946_v55 = vadd.f32 %v1944_v53, %v3210_v11 }
0x2a7d   :  { %2776 = vtanh.f32 %v1946_v55  ;;  %v2234_v57 = vmul.f32 -1.442695, %v1946_v55 }
0x2a7f   :  { %2778 = vpow2.f32 %v2234_v57 }
0x2a87   :  { %v2777_v56 = vpop.eup %2776 }
0x2a88   :  { %1959 = vrot.lane.b32.xlu1 %v2777_v56, %s2911_s24 }
0x2a89   :  { %v2779_v58 = vpop.eup %2778 }
0x2a8a   :  { %v1950_v37 = vadd.f32 1.0, %v2779_v58 }
0x2a8c   :  { %2780 = vrcp.f32 %v1950_v37 }
0x2a96   :  { %v2781_v59 = vpop.eup %2780 }
0x2a97   :  { %v1957_v2 = vmul.f32 %v2781_v59, %v1955_v8 }
0x2afa   :  { %v1960_v61 = vpop.permute.xlu1 %1959 }
0x2afb   :  { %v1962_v62 = vmul.f32 %v2781_v59, %v1960_v61 }
0x2afd   :  { %1964 = vrot.lane.b32.xlu0 %v1962_v62, %s2912_s3 }
0x2b6f   :  { %v1965_v3 = vpop.permute.xlu0 %1964 }
0x2b70   :  { %v1967_v4 = vadd.f32 %v1965_v3, %v1957_v2 }
0x2b72   :  { %2782 = vtanh.f32 %v1967_v4 }
0x2b7c   :  { %v2783_v11 = vpop.eup %2782 }
0x2b7d   :  { %1970 = vrot.lane.b32.xlu1 %v2783_v11, %s2911_s24 }
0x2bef   :  { %v1971_v12 = vpop.permute.xlu1 %1970 }
0x2bf0   :  { %v1973_v5 = vmul.f32 %v2781_v59, %v1971_v12 }
0x2bf2   :  { %v1989_v6 = vrot.slane %v1973_v5, 7  ;;  %v2102_v7 = vsel %vm2000_vm9, %v2101_v50, %v1973_v5 }
0x2bf3   :  { %2104 = vrot.lane.b32.xlu1 %v2102_v7, %s2912_s3 }
0x2bf4   :  { %v2001_v9 = vsel %vm2000_vm9, %v1999_v51, %v1989_v6 }
0x2bf5   :  { %2003 = vrot.lane.b32.xlu0 %v2001_v9, %s2912_s3 }
0x2c65   :  { %v2105_v13 = vpop.permute.xlu1 %2104 }
0x2c67   :  { %v2004_v60 = vpop.permute.xlu0 %2003 }
0x2c68   :  { %2526 = vmatpush3.msra.mxu0 %v2004_v60 }
0x2c69   :  { %2530 = vmatprep.subr.mxu0 %v2910_v1  ;;  %2528 = vmatmul.mubr.msk.f32.vlgmr.msra.gmra.mrb[18].mxu0 %vm2006_vm10, %v1974_v10 }
0x2c6a   :  { %2531 = vmatpush3.msra.mxu0 %v2105_v13  ;;  %2532 = vmatprep.mubr.msk.f32.mxu0 %vm2909_vm0, %v2910_v1 }
0x2c6d   :  { %2533 = vmatmul.mubr.msk.f32.vlgmr.msra.gmra.mrb[20].mxu0 %vm2006_vm10, %v1974_v10 }
0x2d3c   :  { %v2076_v18 = vpop.f32.mrb[18].mxu0 }
0x2d3d   :  { %v2077_v0 = vadd.f32 %v2076_v18, %v1975_v16  ;;  %v2529_v63 = vpop.f32.mrb[19].mxu0 }
0x2d3f   :  { %v2080_v19 = vmax.f32 %v2077_v0, 0.0 }
0x2d40   :  { %v2173_v20 = vpop.f32.mrb[20].mxu0 }
0x2d41   :  { %2082 = vst.msk [vmem:[#allocation10] sm:$0xf] %vm2081_vm11, %v2080_v19  ;;  %v2174_v21 = vadd.f32 %v2173_v20, %v1975_v16  ;;  %v2534_v22 = vpop.f32.mrb[21].mxu0 }
0x2d43   :  { %v2177_v23 = vmax.f32 %v2174_v21, 0.0 }
0x2d45   :  { %2179 = vst.msk [vmem:[#allocation10 + $0x4] sm:$0xf] %vm2081_vm11, %v2177_v23 }
0x2d46   :  { %2883 = shalt.err (!%p2880_p8)
}
0x2d47   :  { %s2884_s21 = scalar_lea.hbm %s3333_s9, 128 }
0x2d48   :  { %p2885_p9 = scmp.ne.s32.totalorder %s3333_s9, %s2884_s21  ;;  %p2888_p10 = scmp.lt.u32.totalorder %s2884_s21, %s3333_s9 }
0x2d4a   :  { %p2890_p11 = pnand %p2888_p10, %p2885_p9 }
0x2d4c   :  { %2893 = shalt.err (!%p2890_p11)
}
0x2d4d   :  { %s2914_s17 = smov 4  }
0x2d4e   :  { %2191 = dma.vmem_to_hbm [thread:$0]  %s2186_s10, 128, %s3333_s9, [#allocation4], %s2911_s24, %s2911_s24, %s2914_s17  }
0x2d4f   :  { %2900 = dma.done.wait [#allocation4], 128  }
0x2d50   :  { %2901 = vsyncadd [#allocation4], 4294967168 }
0x2d51   :  { %2195 = vsyncpa [#allocation3], 1 }
0x2d52   :  { %2196 = vsyncpa [#allocation6], 1 }
0x2d53   :  { %2197 = vsyncpa [#allocation9], 1 }
0x2d54   :  { %2198 = vsyncpa [#allocation4], 1 }

</bundles_post_ra>
